<compile_context>
chip_gen: v6e
topology: v6e:2x2x1
jax: 0.10.0
libtpu: 0.0.40
codegen_flags: <defaults>
</compile_context>

<pallas_src>
import functools

import jax
import jax.numpy as jnp
from jax.experimental import pallas as pl
from jax.experimental.pallas import tpu as pltpu

IN_FEATURES = 28 * 28          # 784
IN_PAD = 896                   # 7 * 128, lane-dense padding of 784
H1, H2, H3 = 512, 256, 128     # encoder widths (decoder mirrors them)


def _round_up(x, m):
    return (x + m - 1) // m * m


# ----------------------------- Pallas kernel ------------------------------ #
def _vae_kernel(
    x_ref, eps_ref,
    w1_ref, b1_ref, w2_ref, b2_ref, w3_ref, b3_ref,
    wh_ref, bh_ref,                       # fused [mu | logvar] head, padded
    wd1_ref, bd1_ref, wd2_ref, bd2_ref, wd3_ref, bd3_ref,
    recon_ref, head_ref,
    *, lat_pad,
):
    def linear(a, w_ref, b_ref):
        # bf16 operands into the MXU, f32 accumulation, f32 bias add.
        return jnp.dot(a.astype(jnp.bfloat16), w_ref[...],
                       preferred_element_type=jnp.float32) + b_ref[...]

    # ---- encoder: Linear + ReLU x3 ----
    h = jnp.maximum(linear(x_ref[...], w1_ref, b1_ref), 0.0)
    h = jnp.maximum(linear(h, w2_ref, b2_ref), 0.0)
    h = jnp.maximum(linear(h, w3_ref, b3_ref), 0.0)           # (TB, 128)

    # ---- fused latent heads: lanes [0,L)=mu, [lat_pad,lat_pad+L)=logvar ----
    head = linear(h, wh_ref, bh_ref)                          # (TB, 2*lat_pad)
    head_ref[...] = head

    # ---- reparametrize, kept lane-dense ----
    # eps_ref carries eps in lanes [lat_pad, lat_pad+L), zeros elsewhere.
    # z: lanes [0,L) = mu, lanes [lat_pad,lat_pad+L) = eps*exp(logvar), rest 0.
    # wd1 has dec1_w duplicated at both lane groups, so one matmul computes
    # (mu + eps*exp(logvar)) @ W_dec1  (torch: std = logvar.exp(), no 0.5).
    lane = jax.lax.broadcasted_iota(jnp.int32, head.shape, 1)
    z = jnp.where(lane < lat_pad, head, eps_ref[...] * jnp.exp(head))

    # ---- decoder: Linear+ReLU x2, Linear+Sigmoid ----
    d = jnp.maximum(linear(z, wd1_ref, bd1_ref), 0.0)
    d = jnp.maximum(linear(d, wd2_ref, bd2_ref), 0.0)
    recon_ref[...] = jax.nn.sigmoid(linear(d, wd3_ref, bd3_ref))


# ------------------------------ parameters -------------------------------- #
def init_vae_params(key, nb_latent):
    """f32 params, PyTorch-style U(-1/sqrt(fan_in), +1/sqrt(fan_in)) init.
    Weights stored as (in, out) = transpose of torch Linear's (out, in)."""
    dims = [
        ("enc1", IN_FEATURES, H1), ("enc2", H1, H2), ("enc3", H2, H3),
        ("z_mean", H3, nb_latent), ("z_log_var", H3, nb_latent),
        ("dec1", nb_latent, H3), ("dec2", H3, H2), ("dec3", H2, IN_FEATURES),
    ]
    params = {}
    for name, fan_in, fan_out in dims:
        key, kw, kb = jax.random.split(key, 3)
        bound = 1.0 / float(fan_in) ** 0.5
        params[name + "_w"] = jax.random.uniform(
            kw, (fan_in, fan_out), jnp.float32, -bound, bound)
        params[name + "_b"] = jax.random.uniform(
            kb, (1, fan_out), jnp.float32, -bound, bound)
    return params


def prepare_kernel_params(params, nb_latent):
    """bf16 weights, f32 biases, lane-dense padding + fused latent head."""
    L = nb_latent
    Lp = _round_up(L, 64)           # half-width of fused head (F = 2*Lp, lane-dense)
    F = 2 * Lp
    bf16 = jnp.bfloat16

    def pad2(a, rows, cols):
        return jnp.zeros((rows, cols), a.dtype).at[:a.shape[0], :a.shape[1]].set(a)

    w1 = pad2(params["enc1_w"], IN_PAD, H1).astype(bf16)        # K: 784 -> 896
    wh = (jnp.zeros((H3, F), jnp.float32)
          .at[:, :L].set(params["z_mean_w"])
          .at[:, Lp:Lp + L].set(params["z_log_var_w"])).astype(bf16)
    bh = (jnp.zeros((1, F), jnp.float32)
          .at[:, :L].set(params["z_mean_b"])
          .at[:, Lp:Lp + L].set(params["z_log_var_b"]))
    wd1 = (jnp.zeros((F, H3), jnp.float32)
           .at[:L, :].set(params["dec1_w"])
           .at[Lp:Lp + L, :].set(params["dec1_w"])).astype(bf16)
    wd3 = pad2(params["dec3_w"], H2, IN_PAD).astype(bf16)       # N: 784 -> 896
    bd3 = jnp.zeros((1, IN_PAD), jnp.float32).at[:, :IN_FEATURES].set(params["dec3_b"])

    return dict(
        w1=w1, b1=params["enc1_b"],
        w2=params["enc2_w"].astype(bf16), b2=params["enc2_b"],
        w3=params["enc3_w"].astype(bf16), b3=params["enc3_b"],
        wh=wh, bh=bh,
        wd1=wd1, bd1=params["dec1_b"],
        wd2=params["dec2_w"].astype(bf16), bd2=params["dec2_b"],
        wd3=wd3, bd3=bd3,
        lat_pad=Lp, nb_latent=L,
    )


# -------------------------------- wrapper ---------------------------------- #
def vae_forward(x, eps, kp):
    """x: (B, 28, 28) f32, eps: (B, nb_latent) f32.
    Returns (recon (B, 28, 28), mu (B, L), logvar (B, L))."""
    B = x.shape[0]
    L = kp["nb_latent"]
    Lp = kp["lat_pad"]
    F = 2 * Lp

    # Batch tiling: one "parallel" grid axis; tile capped so blocks fit
    # comfortably in v7x's 64 MiB VMEM while amortizing the weight DMA.
    TB = min(256, _round_up(B, 8))
    Bp = _round_up(B, TB)
    grid = (Bp // TB,)

    x_pad = jnp.zeros((Bp, IN_PAD), jnp.float32).at[:B, :IN_FEATURES].set(
        x.reshape(B, -1))
    eps_pad = jnp.zeros((Bp, F), jnp.float32).at[:B, Lp:Lp + L].set(eps)

    weights = (kp["w1"], kp["b1"], kp["w2"], kp["b2"], kp["w3"], kp["b3"],
               kp["wh"], kp["bh"],
               kp["wd1"], kp["bd1"], kp["wd2"], kp["bd2"], kp["wd3"], kp["bd3"])

    def row_spec(cols):
        return pl.BlockSpec((TB, cols), lambda i: (i, 0))

    def const_spec(shape):
        return pl.BlockSpec(shape, lambda i: (0,) * len(shape))

    in_specs = [row_spec(IN_PAD), row_spec(F)] + [const_spec(w.shape) for w in weights]
    out_specs = (row_spec(IN_PAD), row_spec(F))
    out_shape = (jax.ShapeDtypeStruct((Bp, IN_PAD), jnp.float32),
                 jax.ShapeDtypeStruct((Bp, F), jnp.float32))

    # Advisory cost estimate so XLA schedules around the custom call sensibly.
    matmul_dims = [(IN_PAD, H1), (H1, H2), (H2, H3), (H3, F),
                   (F, H3), (H3, H2), (H2, IN_PAD)]
    flops = 2 * Bp * sum(a * b for a, b in matmul_dims)
    transcendentals = Bp * (F + IN_PAD)                      # exp + sigmoid
    operands = (x_pad, eps_pad) + weights
    bytes_accessed = sum(int(a.size) * a.dtype.itemsize for a in operands)
    bytes_accessed += (Bp * IN_PAD + Bp * F) * 4             # outputs (f32)

    # VMEM budget: double-buffered blocks + headroom for intermediates,
    # well below v7x's 64 MiB physical VMEM (never request it all).
    weight_bytes = sum(int(w.size) * w.dtype.itemsize for w in weights)
    block_bytes = (TB * IN_PAD + TB * F) * 4 * 2 + weight_bytes
    vmem_limit = int(min(2 * block_bytes + (8 << 20), 32 << 20))

    recon_pad, head = pl.pallas_call(
        functools.partial(_vae_kernel, lat_pad=Lp),
        out_shape=out_shape,
        grid_spec=pltpu.PrefetchScalarGridSpec(
            num_scalar_prefetch=0,
            grid=grid,
            in_specs=in_specs,
            out_specs=out_specs),
        compiler_params=pltpu.CompilerParams(
            dimension_semantics=("parallel",),
            vmem_limit_bytes=vmem_limit),
        cost_estimate=pl.CostEstimate(
            flops=int(flops),
            transcendentals=int(transcendentals),
            bytes_accessed=int(bytes_accessed)),
    )(x_pad, eps_pad, *weights)

    recon = recon_pad[:B, :IN_FEATURES].reshape(B, 28, 28)
    mu = head[:B, :L]
    logvar = head[:B, Lp:Lp + L]
    return recon, mu, logvar


# ------------------------------- reference --------------------------------- #
def ref_forward(x, eps, params):
    """Plain-JAX reference of the same math at the same precision policy
    (bf16 matmul operands, f32 accumulation), without any padding/fusion."""
    def lin(a, w, b):
        return jnp.dot(a.astype(jnp.bfloat16), w.astype(jnp.bfloat16),
                       preferred_element_type=jnp.float32) + b
    h = x.reshape(x.shape[0], -1)
    h = jnp.maximum(lin(h, params["enc1_w"], params["enc1_b"]), 0.0)
    h = jnp.maximum(lin(h, params["enc2_w"], params["enc2_b"]), 0.0)
    h = jnp.maximum(lin(h, params["enc3_w"], params["enc3_b"]), 0.0)
    mu = lin(h, params["z_mean_w"], params["z_mean_b"])
    lv = lin(h, params["z_log_var_w"], params["z_log_var_b"])
    z = eps * jnp.exp(lv) + mu          # torch: std = logvar.exp() (no 0.5)
    d = jnp.maximum(lin(z, params["dec1_w"], params["dec1_b"]), 0.0)
    d = jnp.maximum(lin(d, params["dec2_w"], params["dec2_b"]), 0.0)
    d = jax.nn.sigmoid(lin(d, params["dec3_w"], params["dec3_b"]))
    return d.reshape(x.shape[0], 28, 28), mu, lv


# --------------------------------- main ------------------------------------ #
if __name__ == "__main__":
    nb_latent = 32
    batch = 2

    key = jax.random.PRNGKey(0)
    k_params, k_x, k_eps = jax.random.split(key, 3)

    params = init_vae_params(k_params, nb_latent)
    x = jax.random.uniform(k_x, (batch, 28, 28), jnp.float32)        # "image"
    eps = jax.random.normal(k_eps, (batch, nb_latent), jnp.float32)  # reparam noise
    kparams = prepare_kernel_params(params, nb_latent)

    recon, mu, logvar = vae_forward(x, eps, kparams)
    jax.block_until_ready((recon, mu, logvar))

    r_ref, mu_ref, lv_ref = ref_forward(x, eps, params)
    assert recon.shape == (batch, 28, 28)
    assert mu.shape == (batch, nb_latent) and logvar.shape == (batch, nb_latent)
    # bf16-weight compute: compare against a matching-precision reference.
    assert float(jnp.max(jnp.abs(recon - r_ref))) < 2e-2, "recon mismatch"
    assert float(jnp.max(jnp.abs(mu - mu_ref))) < 2e-2, "mu mismatch"
    assert float(jnp.max(jnp.abs(logvar - lv_ref))) < 2e-2, "logvar mismatch"

    print("KERNEL_OK")
</pallas_src>

<mosaic_0001>
module attributes {stable_mosaic.version = 11 : i64} {
  func.func @_vae_kernel(%arg0: i32, %arg1: memref<8x896xf32, #tpu.memory_space<vmem>>, %arg2: memref<8x128xf32, #tpu.memory_space<vmem>>, %arg3: memref<896x512xbf16, #tpu.memory_space<vmem>>, %arg4: memref<1x512xf32, #tpu.memory_space<vmem>>, %arg5: memref<512x256xbf16, #tpu.memory_space<vmem>>, %arg6: memref<1x256xf32, #tpu.memory_space<vmem>>, %arg7: memref<256x128xbf16, #tpu.memory_space<vmem>>, %arg8: memref<1x128xf32, #tpu.memory_space<vmem>>, %arg9: memref<128x128xbf16, #tpu.memory_space<vmem>>, %arg10: memref<1x128xf32, #tpu.memory_space<vmem>>, %arg11: memref<128x128xbf16, #tpu.memory_space<vmem>>, %arg12: memref<1x128xf32, #tpu.memory_space<vmem>>, %arg13: memref<128x256xbf16, #tpu.memory_space<vmem>>, %arg14: memref<1x256xf32, #tpu.memory_space<vmem>>, %arg15: memref<256x896xbf16, #tpu.memory_space<vmem>>, %arg16: memref<1x896xf32, #tpu.memory_space<vmem>>, %arg17: memref<8x896xf32, #tpu.memory_space<vmem>>, %arg18: memref<8x128xf32, #tpu.memory_space<vmem>>) attributes {dimension_semantics = [#tpu.dimension_semantics<parallel>], iteration_bounds = array<i64: 1>, scalar_prefetch = 0 : i64, scratch_operands = 0 : i64, tpu.core_type = #tpu.core_type<tc>, window_params = [{transform_indices = @transform_0, window_bounds = array<i64: 8, 896>}, {transform_indices = @transform_1, window_bounds = array<i64: 8, 128>}, {pipeline_mode = #tpu.pipeline_mode<synchronous>, transform_indices = @transform_2, window_bounds = array<i64: 896, 512>}, {pipeline_mode = #tpu.pipeline_mode<synchronous>, transform_indices = @transform_3, window_bounds = array<i64: 1, 512>}, {pipeline_mode = #tpu.pipeline_mode<synchronous>, transform_indices = @transform_4, window_bounds = array<i64: 512, 256>}, {pipeline_mode = #tpu.pipeline_mode<synchronous>, transform_indices = @transform_5, window_bounds = array<i64: 1, 256>}, {pipeline_mode = #tpu.pipeline_mode<synchronous>, transform_indices = @transform_6, window_bounds = array<i64: 256, 128>}, {pipeline_mode = #tpu.pipeline_mode<synchronous>, transform_indices = @transform_7, window_bounds = array<i64: 1, 128>}, {pipeline_mode = #tpu.pipeline_mode<synchronous>, transform_indices = @transform_8, window_bounds = array<i64: 128, 128>}, {pipeline_mode = #tpu.pipeline_mode<synchronous>, transform_indices = @transform_9, window_bounds = array<i64: 1, 128>}, {pipeline_mode = #tpu.pipeline_mode<synchronous>, transform_indices = @transform_10, window_bounds = array<i64: 128, 128>}, {pipeline_mode = #tpu.pipeline_mode<synchronous>, transform_indices = @transform_11, window_bounds = array<i64: 1, 128>}, {pipeline_mode = #tpu.pipeline_mode<synchronous>, transform_indices = @transform_12, window_bounds = array<i64: 128, 256>}, {pipeline_mode = #tpu.pipeline_mode<synchronous>, transform_indices = @transform_13, window_bounds = array<i64: 1, 256>}, {pipeline_mode = #tpu.pipeline_mode<synchronous>, transform_indices = @transform_14, window_bounds = array<i64: 256, 896>}, {pipeline_mode = #tpu.pipeline_mode<synchronous>, transform_indices = @transform_15, window_bounds = array<i64: 1, 896>}, {transform_indices = @transform_16, window_bounds = array<i64: 8, 896>}, {transform_indices = @transform_17, window_bounds = array<i64: 8, 128>}]} {
    %c0 = arith.constant 0 : index
    %c0_0 = arith.constant 0 : index
    %0 = vector.load %arg1[%c0, %c0_0] : memref<8x896xf32, #tpu.memory_space<vmem>>, vector<8x896xf32>
    %1 = arith.truncf %0 : vector<8x896xf32> to vector<8x896xbf16>
    %c0_1 = arith.constant 0 : index
    %c0_2 = arith.constant 0 : index
    %2 = vector.load %arg3[%c0_1, %c0_2] : memref<896x512xbf16, #tpu.memory_space<vmem>>, vector<896x512xbf16>
    %cst = arith.constant dense<0.000000e+00> : vector<8x512xf32>
    %3 = tpu.matmul %1, %2, %cst {dimension_numbers = #tpu.dot_dimension_numbers<[1], [0], [0], [1], [0, 0, 1, 1], [], []>} : vector<8x896xbf16>, vector<896x512xbf16>, vector<8x512xf32> -> vector<8x512xf32>
    %c0_3 = arith.constant 0 : index
    %c0_4 = arith.constant 0 : index
    %4 = vector.load %arg4[%c0_3, %c0_4] : memref<1x512xf32, #tpu.memory_space<vmem>>, vector<1x512xf32>
    %5 = vector.broadcast %4 : vector<1x512xf32> to vector<8x512xf32>
    %6 = arith.addf %3, %5 : vector<8x512xf32>
    %cst_5 = arith.constant 0.000000e+00 : f32
    %7 = vector.broadcast %cst_5 : f32 to vector<8x512xf32>
    %8 = arith.maximumf %6, %7 : vector<8x512xf32>
    %9 = arith.truncf %8 : vector<8x512xf32> to vector<8x512xbf16>
    %c0_6 = arith.constant 0 : index
    %c0_7 = arith.constant 0 : index
    %10 = vector.load %arg5[%c0_6, %c0_7] : memref<512x256xbf16, #tpu.memory_space<vmem>>, vector<512x256xbf16>
    %cst_8 = arith.constant dense<0.000000e+00> : vector<8x256xf32>
    %11 = tpu.matmul %9, %10, %cst_8 {dimension_numbers = #tpu.dot_dimension_numbers<[1], [0], [0], [1], [0, 0, 1, 1], [], []>} : vector<8x512xbf16>, vector<512x256xbf16>, vector<8x256xf32> -> vector<8x256xf32>
    %c0_9 = arith.constant 0 : index
    %c0_10 = arith.constant 0 : index
    %12 = vector.load %arg6[%c0_9, %c0_10] : memref<1x256xf32, #tpu.memory_space<vmem>>, vector<1x256xf32>
    %13 = vector.broadcast %12 : vector<1x256xf32> to vector<8x256xf32>
    %14 = arith.addf %11, %13 : vector<8x256xf32>
    %cst_11 = arith.constant 0.000000e+00 : f32
    %15 = vector.broadcast %cst_11 : f32 to vector<8x256xf32>
    %16 = arith.maximumf %14, %15 : vector<8x256xf32>
    %17 = arith.truncf %16 : vector<8x256xf32> to vector<8x256xbf16>
    %c0_12 = arith.constant 0 : index
    %c0_13 = arith.constant 0 : index
    %18 = vector.load %arg7[%c0_12, %c0_13] : memref<256x128xbf16, #tpu.memory_space<vmem>>, vector<256x128xbf16>
    %cst_14 = arith.constant dense<0.000000e+00> : vector<8x128xf32>
    %19 = tpu.matmul %17, %18, %cst_14 {dimension_numbers = #tpu.dot_dimension_numbers<[1], [0], [0], [1], [0, 0, 1, 1], [], []>} : vector<8x256xbf16>, vector<256x128xbf16>, vector<8x128xf32> -> vector<8x128xf32>
    %c0_15 = arith.constant 0 : index
    %c0_16 = arith.constant 0 : index
    %20 = vector.load %arg8[%c0_15, %c0_16] : memref<1x128xf32, #tpu.memory_space<vmem>>, vector<1x128xf32>
    %21 = vector.broadcast %20 : vector<1x128xf32> to vector<8x128xf32>
    %22 = arith.addf %19, %21 : vector<8x128xf32>
    %cst_17 = arith.constant 0.000000e+00 : f32
    %23 = vector.broadcast %cst_17 : f32 to vector<8x128xf32>
    %24 = arith.maximumf %22, %23 : vector<8x128xf32>
    %25 = arith.truncf %24 : vector<8x128xf32> to vector<8x128xbf16>
    %c0_18 = arith.constant 0 : index
    %c0_19 = arith.constant 0 : index
    %26 = vector.load %arg9[%c0_18, %c0_19] : memref<128x128xbf16, #tpu.memory_space<vmem>>, vector<128x128xbf16>
    %cst_20 = arith.constant dense<0.000000e+00> : vector<8x128xf32>
    %27 = tpu.matmul %25, %26, %cst_20 {dimension_numbers = #tpu.dot_dimension_numbers<[1], [0], [0], [1], [0, 0, 1, 1], [], []>} : vector<8x128xbf16>, vector<128x128xbf16>, vector<8x128xf32> -> vector<8x128xf32>
    %c0_21 = arith.constant 0 : index
    %c0_22 = arith.constant 0 : index
    %28 = vector.load %arg10[%c0_21, %c0_22] : memref<1x128xf32, #tpu.memory_space<vmem>>, vector<1x128xf32>
    %29 = vector.broadcast %28 : vector<1x128xf32> to vector<8x128xf32>
    %30 = arith.addf %27, %29 : vector<8x128xf32>
    %c0_23 = arith.constant 0 : index
    %c0_24 = arith.constant 0 : index
    %31 = vector.load %arg18[%c0_23, %c0_24] : memref<8x128xf32, #tpu.memory_space<vmem>>, vector<8x128xf32>
    tpu.vector_store %arg18[%c0_23, %c0_24], %30 {strides = array<i32>} : memref<8x128xf32, #tpu.memory_space<vmem>>, vector<8x128xf32>,
    %32 = tpu.iota {dimensions = array<i32: 1>} : vector<8x128xi32>
    %c64_i32 = arith.constant 64 : i32
    %33 = vector.broadcast %c64_i32 : i32 to vector<8x128xi32>
    %34 = arith.cmpi slt, %32, %33 : vector<8x128xi32>
    %c0_25 = arith.constant 0 : index
    %c0_26 = arith.constant 0 : index
    %35 = vector.load %arg2[%c0_25, %c0_26] : memref<8x128xf32, #tpu.memory_space<vmem>>, vector<8x128xf32>
    %36 = math.exp %30 : vector<8x128xf32>
    %37 = arith.mulf %35, %36 : vector<8x128xf32>
    %38 = arith.select %34, %30, %37 : vector<8x128xi1>, vector<8x128xf32>
    %39 = arith.truncf %38 : vector<8x128xf32> to vector<8x128xbf16>
    %c0_27 = arith.constant 0 : index
    %c0_28 = arith.constant 0 : index
    %40 = vector.load %arg11[%c0_27, %c0_28] : memref<128x128xbf16, #tpu.memory_space<vmem>>, vector<128x128xbf16>
    %cst_29 = arith.constant dense<0.000000e+00> : vector<8x128xf32>
    %41 = tpu.matmul %39, %40, %cst_29 {dimension_numbers = #tpu.dot_dimension_numbers<[1], [0], [0], [1], [0, 0, 1, 1], [], []>} : vector<8x128xbf16>, vector<128x128xbf16>, vector<8x128xf32> -> vector<8x128xf32>
    %c0_30 = arith.constant 0 : index
    %c0_31 = arith.constant 0 : index
    %42 = vector.load %arg12[%c0_30, %c0_31] : memref<1x128xf32, #tpu.memory_space<vmem>>, vector<1x128xf32>
    %43 = vector.broadcast %42 : vector<1x128xf32> to vector<8x128xf32>
    %44 = arith.addf %41, %43 : vector<8x128xf32>
    %cst_32 = arith.constant 0.000000e+00 : f32
    %45 = vector.broadcast %cst_32 : f32 to vector<8x128xf32>
    %46 = arith.maximumf %44, %45 : vector<8x128xf32>
    %47 = arith.truncf %46 : vector<8x128xf32> to vector<8x128xbf16>
    %c0_33 = arith.constant 0 : index
    %c0_34 = arith.constant 0 : index
    %48 = vector.load %arg13[%c0_33, %c0_34] : memref<128x256xbf16, #tpu.memory_space<vmem>>, vector<128x256xbf16>
    %cst_35 = arith.constant dense<0.000000e+00> : vector<8x256xf32>
    %49 = tpu.matmul %47, %48, %cst_35 {dimension_numbers = #tpu.dot_dimension_numbers<[1], [0], [0], [1], [0, 0, 1, 1], [], []>} : vector<8x128xbf16>, vector<128x256xbf16>, vector<8x256xf32> -> vector<8x256xf32>
    %c0_36 = arith.constant 0 : index
    %c0_37 = arith.constant 0 : index
    %50 = vector.load %arg14[%c0_36, %c0_37] : memref<1x256xf32, #tpu.memory_space<vmem>>, vector<1x256xf32>
    %51 = vector.broadcast %50 : vector<1x256xf32> to vector<8x256xf32>
    %52 = arith.addf %49, %51 : vector<8x256xf32>
    %cst_38 = arith.constant 0.000000e+00 : f32
    %53 = vector.broadcast %cst_38 : f32 to vector<8x256xf32>
    %54 = arith.maximumf %52, %53 : vector<8x256xf32>
    %55 = arith.truncf %54 : vector<8x256xf32> to vector<8x256xbf16>
    %c0_39 = arith.constant 0 : index
    %c0_40 = arith.constant 0 : index
    %56 = vector.load %arg15[%c0_39, %c0_40] : memref<256x896xbf16, #tpu.memory_space<vmem>>, vector<256x896xbf16>
    %cst_41 = arith.constant dense<0.000000e+00> : vector<8x896xf32>
    %57 = tpu.matmul %55, %56, %cst_41 {dimension_numbers = #tpu.dot_dimension_numbers<[1], [0], [0], [1], [0, 0, 1, 1], [], []>} : vector<8x256xbf16>, vector<256x896xbf16>, vector<8x896xf32> -> vector<8x896xf32>
    %c0_42 = arith.constant 0 : index
    %c0_43 = arith.constant 0 : index
    %58 = vector.load %arg16[%c0_42, %c0_43] : memref<1x896xf32, #tpu.memory_space<vmem>>, vector<1x896xf32>
    %59 = vector.broadcast %58 : vector<1x896xf32> to vector<8x896xf32>
    %60 = arith.addf %57, %59 : vector<8x896xf32>
    %61 = arith.negf %60 : vector<8x896xf32>
    %62 = math.exp %61 : vector<8x896xf32>
    %cst_44 = arith.constant 1.000000e+00 : f32
    %63 = vector.broadcast %cst_44 : f32 to vector<8x896xf32>
    %64 = arith.addf %63, %62 : vector<8x896xf32>
    %65 = arith.divf %63, %64 : vector<8x896xf32>
    %c0_45 = arith.constant 0 : index
    %c0_46 = arith.constant 0 : index
    %66 = vector.load %arg17[%c0_45, %c0_46] : memref<8x896xf32, #tpu.memory_space<vmem>>, vector<8x896xf32>
    tpu.vector_store %arg17[%c0_45, %c0_46], %65 {strides = array<i32>} : memref<8x896xf32, #tpu.memory_space<vmem>>, vector<8x896xf32>,
    return
  }
  func.func @transform_0(%arg0: i32) -> (i32, i32) {
    %c0_i32 = arith.constant 0 : i32
    %c0_i32_0 = arith.constant 0 : i32
    return %arg0, %c0_i32 : i32, i32
  }
  func.func @transform_1(%arg0: i32) -> (i32, i32) {
    %c0_i32 = arith.constant 0 : i32
    %c0_i32_0 = arith.constant 0 : i32
    return %arg0, %c0_i32 : i32, i32
  }
  func.func @transform_2(%arg0: i32) -> (i32, i32) {
    %c0_i32 = arith.constant 0 : i32
    %c0_i32_0 = arith.constant 0 : i32
    %c0_i32_1 = arith.constant 0 : i32
    return %c0_i32, %c0_i32_0 : i32, i32
  }
  func.func @transform_3(%arg0: i32) -> (i32, i32) {
    %c0_i32 = arith.constant 0 : i32
    %c0_i32_0 = arith.constant 0 : i32
    %c0_i32_1 = arith.constant 0 : i32
    return %c0_i32, %c0_i32_0 : i32, i32
  }
  func.func @transform_4(%arg0: i32) -> (i32, i32) {
    %c0_i32 = arith.constant 0 : i32
    %c0_i32_0 = arith.constant 0 : i32
    %c0_i32_1 = arith.constant 0 : i32
    return %c0_i32, %c0_i32_0 : i32, i32
  }
  func.func @transform_5(%arg0: i32) -> (i32, i32) {
    %c0_i32 = arith.constant 0 : i32
    %c0_i32_0 = arith.constant 0 : i32
    %c0_i32_1 = arith.constant 0 : i32
    return %c0_i32, %c0_i32_0 : i32, i32
  }
  func.func @transform_6(%arg0: i32) -> (i32, i32) {
    %c0_i32 = arith.constant 0 : i32
    %c0_i32_0 = arith.constant 0 : i32
    %c0_i32_1 = arith.constant 0 : i32
    return %c0_i32, %c0_i32_0 : i32, i32
  }
  func.func @transform_7(%arg0: i32) -> (i32, i32) {
    %c0_i32 = arith.constant 0 : i32
    %c0_i32_0 = arith.constant 0 : i32
    %c0_i32_1 = arith.constant 0 : i32
    return %c0_i32, %c0_i32_0 : i32, i32
  }
  func.func @transform_8(%arg0: i32) -> (i32, i32) {
    %c0_i32 = arith.constant 0 : i32
    %c0_i32_0 = arith.constant 0 : i32
    %c0_i32_1 = arith.constant 0 : i32
    return %c0_i32, %c0_i32_0 : i32, i32
  }
  func.func @transform_9(%arg0: i32) -> (i32, i32) {
    %c0_i32 = arith.constant 0 : i32
    %c0_i32_0 = arith.constant 0 : i32
    %c0_i32_1 = arith.constant 0 : i32
    return %c0_i32, %c0_i32_0 : i32, i32
  }
  func.func @transform_10(%arg0: i32) -> (i32, i32) {
    %c0_i32 = arith.constant 0 : i32
    %c0_i32_0 = arith.constant 0 : i32
    %c0_i32_1 = arith.constant 0 : i32
    return %c0_i32, %c0_i32_0 : i32, i32
  }
  func.func @transform_11(%arg0: i32) -> (i32, i32) {
    %c0_i32 = arith.constant 0 : i32
    %c0_i32_0 = arith.constant 0 : i32
    %c0_i32_1 = arith.constant 0 : i32
    return %c0_i32, %c0_i32_0 : i32, i32
  }
  func.func @transform_12(%arg0: i32) -> (i32, i32) {
    %c0_i32 = arith.constant 0 : i32
    %c0_i32_0 = arith.constant 0 : i32
    %c0_i32_1 = arith.constant 0 : i32
    return %c0_i32, %c0_i32_0 : i32, i32
  }
  func.func @transform_13(%arg0: i32) -> (i32, i32) {
    %c0_i32 = arith.constant 0 : i32
    %c0_i32_0 = arith.constant 0 : i32
    %c0_i32_1 = arith.constant 0 : i32
    return %c0_i32, %c0_i32_0 : i32, i32
  }
  func.func @transform_14(%arg0: i32) -> (i32, i32) {
    %c0_i32 = arith.constant 0 : i32
    %c0_i32_0 = arith.constant 0 : i32
    %c0_i32_1 = arith.constant 0 : i32
    return %c0_i32, %c0_i32_0 : i32, i32
  }
  func.func @transform_15(%arg0: i32) -> (i32, i32) {
    %c0_i32 = arith.constant 0 : i32
    %c0_i32_0 = arith.constant 0 : i32
    %c0_i32_1 = arith.constant 0 : i32
    return %c0_i32, %c0_i32_0 : i32, i32
  }
  func.func @transform_16(%arg0: i32) -> (i32, i32) {
    %c0_i32 = arith.constant 0 : i32
    %c0_i32_0 = arith.constant 0 : i32
    return %arg0, %c0_i32 : i32, i32
  }
  func.func @transform_17(%arg0: i32) -> (i32, i32) {
    %c0_i32 = arith.constant 0 : i32
    %c0_i32_0 = arith.constant 0 : i32
    return %arg0, %c0_i32 : i32, i32
  }
}

</mosaic_0001>

<bundles_post_ra>
// kernel: tpu_custom_call.1
= control target key start
LH: loop header
LB: loop body
LE: loop exit
PB: predicated region body
PF: predicated region fallthrough
CT: control target
= control target key end

     0   :  { %s5734_s0 = inlined_call_operand.hbm [shape: f32[8,896], index: 0, kind: input, shape index: {}]   ;;  %s5735_s1 = inlined_call_operand.hbm [shape: f32[8,128], index: 1, kind: input, shape index: {}]   ;;  %s5736_s2 = inlined_call_operand.hbm [shape: bf16[896,512], index: 2, kind: input, shape index: {}]   ;;  %s5737_s3 = inlined_call_operand.vmem [shape: f32[1,512], index: 3, kind: input, shape index: {}]   ;;  %s5738_s4 = inlined_call_operand.hbm [shape: bf16[512,256], index: 4, kind: input, shape index: {}]   ;;  %s5739_s5 = inlined_call_operand.vmem [shape: f32[1,256], index: 5, kind: input, shape index: {}]   ;;  %s5740_s6 = inlined_call_operand.hbm [shape: bf16[256,128], index: 6, kind: input, shape index: {}]   ;;  %s5741_s7 = inlined_call_operand.vmem [shape: f32[1,128], index: 7, kind: input, shape index: {}]   ;;  %s5742_s8 = inlined_call_operand.hbm [shape: bf16[128,128], index: 8, kind: input, shape index: {}]   ;;  %s5743_s9 = inlined_call_operand.hbm [shape: f32[1,128], index: 9, kind: input, shape index: {}]   ;;  %s5744_s10 = inlined_call_operand.hbm [shape: bf16[128,128], index: 10, kind: input, shape index: {}]   ;;  %s5745_s11 = inlined_call_operand.vmem [shape: f32[1,128], index: 11, kind: input, shape index: {}]   ;;  %s5746_s12 = inlined_call_operand.hbm [shape: bf16[128,256], index: 12, kind: input, shape index: {}]   ;;  %s5747_s13 = inlined_call_operand.vmem [shape: f32[1,256], index: 13, kind: input, shape index: {}]   ;;  %s5748_s14 = inlined_call_operand.hbm [shape: bf16[256,896], index: 14, kind: input, shape index: {}]   ;;  %s5749_s15 = inlined_call_operand.vmem [shape: f32[1,896], index: 15, kind: input, shape index: {}]   ;;  %s5750_s16 = inlined_call_operand.hbm [shape: f32[8,896], index: 16, kind: output, shape index: {0}]   ;;  %s5751_s17 = inlined_call_operand.hbm [shape: f32[8,128], index: 17, kind: output, shape index: {1}]  }
   0x1   :  { %5752 = sst [smem:[#allocation30_spill]] %s5734_s0 }
   0x2   :  { %5753 = sst [smem:[#allocation31_spill]] %s5735_s1 }
   0x3   :  { %23 = vsyncpa [#allocation3], 0 }
   0x4   :  { %24 = vsyncpa [#allocation6], 0 }
   0x5   :  { %25 = vsyncpa [#allocation9], 0 }
   0x6   :  { %26 = vsyncpa [#allocation12], 0 }
   0x7   :  { %27 = vsyncpa [#allocation15], 0 }
   0x8   :  { %28 = vsyncpa [#allocation18], 0 }
   0x9   :  { %29 = vsyncpa [#allocation4], 0 }
   0xa   :  { %30 = vsyncpa [#allocation21], 0  ;;  %s5454_s24 = smov [#allocation5]   ;;  %s5455_s26 = smov [#allocation8]  }
   0xb   :  { %s47_s25 = sshll.u32 %s5454_s24, 4  ;;  %s70_s27 = sshll.u32 %s5455_s26, 4  ;;  %s48_s25 = int_to_ptr.vmem [resolvable:$true] %s47_s25  ;;  %s71_s27 = int_to_ptr.vmem [resolvable:$true] %s70_s27 }
   0xc   :  { %s5206_s28 = scalar_lea.vmem %s48_s25, 128  ;;  %p5211_p1 = scmp.lt.s32.totalorder %s48_s25, %s48_s25 }
   0xd   :  { %p5207_p0 = scmp.ne.s32.totalorder %s48_s25, %s5206_s28  ;;  %p5212_p2 = scmp.lt.s32.totalorder %s5206_s28, %s5206_s28 }
   0xf   :  { %p5213_p3 = por %p5212_p2, %p5211_p1 }
  0x11   :  { %p5214_p4 = pnand %p5213_p3, %p5207_p0 }
  0x13   :  { %5217 = shalt.err (!%p5214_p4)
}
  0x14   :  { %s5754_s30 = sld [smem:[#allocation31_spill]]  ;;  %s5226_s18 = scalar_lea.vmem %s71_s27, 8192 }
  0x15   :  { %p5227_p5 = scmp.ne.s32.totalorder %s71_s27, %s5226_s18  ;;  %p5231_p6 = scmp.lt.s32.totalorder %s71_s27, %s71_s27 }
  0x16   :  { %p5232_p7 = scmp.lt.s32.totalorder %s5226_s18, %s5226_s18 }
  0x18   :  { %p5233_p8 = por %p5232_p7, %p5231_p6 }
  0x1a   :  { %50 = dma.hbm_to_vmem [thread:$0]  %s5754_s30, 128, %s48_s25, [#allocation6]  }
  0x1b   :  { %p5234_p9 = pnand %p5233_p8, %p5227_p5 }
  0x1d   :  { %5237 = shalt.err (!%p5234_p9)
}
  0x1e   :  { %s5456_s19 = smov 128   ;;  %s5457_s1 = smov 8  }
  0x1f   :  { %76 = dma.hbm_to_vmem [thread:$0]  %s5738_s4, 8192, %s71_s27, [#allocation9], %s5456_s19, %s5456_s19, %s5457_s1  }
  0x20   :  { %s5458_s22 = smov [#allocation11]   ;;  %s5459_s24 = smov [#allocation14]  }
  0x21   :  { %s98_s23 = sshll.u32 %s5458_s22, 4  ;;  %s120_s25 = sshll.u32 %s5459_s24, 4  ;;  %s99_s23 = int_to_ptr.vmem [resolvable:$true] %s98_s23  ;;  %s121_s25 = int_to_ptr.vmem [resolvable:$true] %s120_s25 }
  0x22   :  { %s5246_s26 = scalar_lea.vmem %s99_s23, 1024  ;;  %p5251_p11 = scmp.lt.s32.totalorder %s99_s23, %s99_s23 }
  0x23   :  { %p5247_p10 = scmp.ne.s32.totalorder %s99_s23, %s5246_s26  ;;  %p5252_p12 = scmp.lt.s32.totalorder %s5246_s26, %s5246_s26 }
  0x25   :  { %p5253_p13 = por %p5252_p12, %p5251_p11 }
  0x27   :  { %p5254_p0 = pnand %p5253_p13, %p5247_p10 }
  0x29   :  { %5257 = shalt.err (!%p5254_p0)
}
  0x2a   :  { %s5460_s28 = smov 64   ;;  %s5461_s29 = smov 4  }
  0x2b   :  { %104 = dma.hbm_to_vmem [thread:$0]  %s5742_s8, 1024, %s99_s23, [#allocation12], %s5460_s28, %s5460_s28, %s5461_s29  }
  0x2c   :  { %s5266_s27 = scalar_lea.vmem %s121_s25, 1024  ;;  %p5271_p2 = scmp.lt.s32.totalorder %s121_s25, %s121_s25 }
  0x2d   :  { %p5267_p1 = scmp.ne.s32.totalorder %s121_s25, %s5266_s27  ;;  %p5272_p3 = scmp.lt.s32.totalorder %s5266_s27, %s5266_s27 }
  0x2f   :  { %p5273_p4 = por %p5272_p3, %p5271_p2 }
  0x31   :  { %p5274_p5 = pnand %p5273_p4, %p5267_p1 }
  0x33   :  { %5277 = shalt.err (!%p5274_p5)
}
  0x34   :  { %126 = dma.hbm_to_vmem [thread:$0]  %s5744_s10, 1024, %s121_s25, [#allocation15], %s5460_s28, %s5460_s28, %s5461_s29  }
  0x35   :  { %s5462_s20 = smov [#allocation2]   ;;  %s5463_s22 = smov [#allocation7]  }
  0x36   :  { %s37_s21 = sshll.u32 %s5462_s20, 4  ;;  %s56_s24 = sshll.u32 %s5463_s22, 4  ;;  %s38_s21 = int_to_ptr.vmem [resolvable:$true] %s37_s21  ;;  %s57_s24 = int_to_ptr.vmem [resolvable:$true] %s56_s24 }
  0x37   :  { %s5286_s8 = scalar_lea.vmem %s38_s21, 896  ;;  %p5291_p7 = scmp.lt.s32.totalorder %s38_s21, %s38_s21 }
  0x38   :  { %p5287_p6 = scmp.ne.s32.totalorder %s38_s21, %s5286_s8  ;;  %p5292_p8 = scmp.lt.s32.totalorder %s5286_s8, %s5286_s8 }
  0x3a   :  { %p5293_p9 = por %p5292_p8, %p5291_p7 }
  0x3c   :  { %p5294_p10 = pnand %p5293_p9, %p5287_p6 }
  0x3e   :  { %5297 = shalt.err (!%p5294_p10)
}
  0x3f   :  { %s5755_s0 = sld [smem:[#allocation30_spill]]  ;;  %s5306_s4 = scalar_lea.vmem %s57_s24, 28672 }
  0x40   :  { %p5307_p11 = scmp.ne.s32.totalorder %s57_s24, %s5306_s4  ;;  %p5311_p12 = scmp.lt.s32.totalorder %s57_s24, %s57_s24 }
  0x41   :  { %p5312_p13 = scmp.lt.s32.totalorder %s5306_s4, %s5306_s4 }
  0x43   :  { %p5313_p0 = por %p5312_p13, %p5311_p12 }
  0x45   :  { %40 = dma.hbm_to_vmem [thread:$0]  %s5755_s0, 896, %s38_s21, [#allocation3]  }
  0x46   :  { %p5314_p1 = pnand %p5313_p0, %p5307_p11 }
  0x48   :  { %5317 = shalt.err (!%p5314_p1)
}
  0x49   :  { %s5464_s10 = smov 256   ;;  %s5465_s25 = smov 16  }
  0x4a   :  { %62 = dma.hbm_to_vmem [thread:$0]  %s5736_s2, 28672, %s57_s24, [#allocation6], %s5464_s10, %s5464_s10, %s5465_s25  }
  0x4b   :  { %s5466_s18 = smov [#allocation10]   ;;  %s5467_s22 = smov [#allocation13]  }
  0x4c   :  { %s84_s20 = sshll.u32 %s5466_s18, 4  ;;  %s111_s8 = sshll.u32 %s5467_s22, 4  ;;  %s85_s20 = int_to_ptr.vmem [resolvable:$true] %s84_s20  ;;  %s112_s8 = int_to_ptr.vmem [resolvable:$true] %s111_s8 }
  0x4d   :  { %s5326_s21 = scalar_lea.vmem %s85_s20, 2048  ;;  %p5331_p3 = scmp.lt.s32.totalorder %s85_s20, %s85_s20 }
  0x4e   :  { %p5327_p2 = scmp.ne.s32.totalorder %s85_s20, %s5326_s21  ;;  %p5332_p4 = scmp.lt.s32.totalorder %s5326_s21, %s5326_s21 }
  0x50   :  { %p5333_p5 = por %p5332_p4, %p5331_p3 }
  0x52   :  { %p5334_p6 = pnand %p5333_p5, %p5327_p2 }
  0x54   :  { %5337 = shalt.err (!%p5334_p6)
}
  0x55   :  { %90 = dma.hbm_to_vmem [thread:$0]  %s5740_s6, 2048, %s85_s20, [#allocation9], %s5460_s28, %s5460_s28, %s5461_s29  }
  0x56   :  { %s5346_s2 = scalar_lea.vmem %s112_s8, 16  ;;  %s5350_s24 = scalar_lea.vmem %s112_s8, 32 }
  0x57   :  { %p5347_p7 = scmp.ne.s32.totalorder %s112_s8, %s5346_s2  ;;  %p5351_p8 = scmp.lt.s32.totalorder %s112_s8, %s112_s8 }
  0x58   :  { %p5352_p9 = scmp.lt.s32.totalorder %s5350_s24, %s5346_s2 }
  0x5a   :  { %p5353_p10 = por %p5352_p9, %p5351_p8 }
  0x5c   :  { %p5354_p11 = pnand %p5353_p10, %p5347_p7 }
  0x5e   :  { %5357 = shalt.err (!%p5354_p11)
}
  0x5f   :  { %114 = dma.hbm_to_vmem [thread:$0]  %s5743_s9, 16, %s112_s8, [#allocation12]  }
  0x60   :  { %s5468_s10 = smov [#allocation16]   ;;  %s5469_s27 = smov [#allocation17]  }
  0x61   :  { %s134_s25 = sshll.u32 %s5468_s10, 4  ;;  %s148_s30 = sshll.u32 %s5469_s27, 4  ;;  %s135_s25 = int_to_ptr.vmem [resolvable:$true] %s134_s25  ;;  %s149_s30 = int_to_ptr.vmem [resolvable:$true] %s148_s30 }
  0x62   :  { %s5366_s18 = scalar_lea.vmem %s135_s25, 2048  ;;  %p5371_p13 = scmp.lt.s32.totalorder %s135_s25, %s135_s25 }
  0x63   :  { %p5367_p12 = scmp.ne.s32.totalorder %s135_s25, %s5366_s18  ;;  %p5372_p0 = scmp.lt.s32.totalorder %s5366_s18, %s5366_s18 }
  0x65   :  { %p5373_p1 = por %p5372_p0, %p5371_p13 }
  0x67   :  { %p5374_p2 = pnand %p5373_p1, %p5367_p12 }
  0x69   :  { %5377 = shalt.err (!%p5374_p2)
}
  0x6a   :  { %140 = dma.hbm_to_vmem [thread:$0]  %s5746_s12, 2048, %s135_s25, [#allocation15], %s5456_s19, %s5456_s19, %s5457_s1  }
  0x6b   :  { %s5386_s9 = scalar_lea.vmem %s149_s30, 14336  ;;  %p5391_p4 = scmp.lt.s32.totalorder %s149_s30, %s149_s30 }
  0x6c   :  { %p5387_p3 = scmp.ne.s32.totalorder %s149_s30, %s5386_s9  ;;  %p5392_p5 = scmp.lt.s32.totalorder %s5386_s9, %s5386_s9 }
  0x6e   :  { %p5393_p6 = por %p5392_p5, %p5391_p4 }
  0x70   :  { %p5394_p7 = pnand %p5393_p6, %p5387_p3 }
  0x72   :  { %5397 = shalt.err (!%p5394_p7)
}
  0x73   :  { %s5470_s29 = smov 448   ;;  %s5471_s20 = smov 28  }
  0x74   :  { %154 = dma.hbm_to_vmem [thread:$0]  %s5748_s14, 14336, %s149_s30, [#allocation18], %s5470_s29, %s5470_s29, %s5471_s20  }
  0x75   :  { %5438 = dma.done.wait [#allocation3], 896  }
  0x76   :  { %5439 = vsyncadd [#allocation3], 4294966400 }
  0x77   :  { %5440 = dma.done.wait [#allocation6], 28800  }
  0x78   :  { %5441 = vsyncadd [#allocation6], 4294938496 }
  0x79   :  { %5442 = dma.done.wait [#allocation9], 10240  }
  0x7a   :  { %5443 = vsyncadd [#allocation9], 4294957056 }
  0x7b   :  { %5444 = dma.done.wait [#allocation12], 1040  }
  0x7c   :  { %5445 = vsyncadd [#allocation12], 4294966256 }
  0x7d   :  { %5446 = dma.done.wait [#allocation15], 3072  }
  0x7e   :  { %5447 = vsyncadd [#allocation15], 4294964224 }
  0x7f   :  { %5448 = dma.done.wait [#allocation18], 14336  }
  0x80   :  { %5449 = vsyncadd [#allocation18], 4294952960  ;;  %v4520_v0 = vld [vmem:[#allocation7 + $0xe4] ss:$16 sps:$4 sm:$0xff]   ;;  %v4524_v2 = vld [vmem:[#allocation7 + $0xe0] ss:$16 sps:$4 sm:$0xff]  }
  0x81   :  { %v4522_v1 = vld [vmem:[#allocation7 + $0x2e4] ss:$16 sps:$4 sm:$0xff]   ;;  %1568 = vmatprep.subr.bf16.mxu0 %v4520_v0  ;;  %v4525_v3 = vld [vmem:[#allocation7 + $0x2e0] ss:$16 sps:$4 sm:$0xff]   ;;  %v189_v46 = vld [vmem:[#allocation2 + $0x8] sm:$0xff]  ;;  %vm5474_vm0 = vmmov 0  }
  0x82   :  { %1609 = vmatprep.subr.bf16.mxu1 %v4522_v1  ;;  %v4526_v4 = vld [vmem:[#allocation7 + $0xc4] ss:$16 sps:$4 sm:$0xff]   ;;  %1569 = vmatpush1.bf16.msra.mxu0 %v4524_v2  ;;  %v4530_v6 = vld [vmem:[#allocation7 + $0xc0] ss:$16 sps:$4 sm:$0xff]   ;;  %v5612_v49 = vpack.c.bf16 %v189_v46, %v189_v46  ;;  %v191_v50 = vld [vmem:[#allocation2 + $0x18] sm:$0xff] }
  0x83   :  { %1610 = vmatpush1.bf16.msra.mxu1 %v4525_v3  ;;  %v4528_v5 = vld [vmem:[#allocation7 + $0x2c4] ss:$16 sps:$4 sm:$0xff]   ;;  %1570 = vmatprep.subr.bf16.mxu0 %v4526_v4  ;;  %v4531_v7 = vld [vmem:[#allocation7 + $0x2c0] ss:$16 sps:$4 sm:$0xff]   ;;  %v5614_v52 = vpack.c.bf16 %v191_v50, %v191_v50 }
  0x84   :  { %1611 = vmatprep.subr.bf16.mxu1 %v4528_v5  ;;  %v4532_v8 = vld [vmem:[#allocation7 + $0xa4] ss:$16 sps:$4 sm:$0xff]   ;;  %v4536_v10 = vld [vmem:[#allocation7 + $0xa0] ss:$16 sps:$4 sm:$0xff]   ;;  %1600 = vmatprep.mubr.bf16.mxu0 %v5612_v49 }
  0x85   :  { %v4534_v9 = vld [vmem:[#allocation7 + $0x2a4] ss:$16 sps:$4 sm:$0xff]   ;;  %v4537_v11 = vld [vmem:[#allocation7 + $0x2a0] ss:$16 sps:$4 sm:$0xff]   ;;  %1641 = vmatprep.mubr.bf16.mxu1 %v5614_v52 }
  0x86   :  { %1571 = vmatpush1.bf16.msra.mxu0 %v4530_v6  ;;  %v4538_v12 = vld [vmem:[#allocation7 + $0x84] ss:$16 sps:$4 sm:$0xff]   ;;  %v4542_v14 = vld [vmem:[#allocation7 + $0x80] ss:$16 sps:$4 sm:$0xff]  }
  0x87   :  { %1612 = vmatpush1.bf16.msra.mxu1 %v4531_v7  ;;  %1572 = vmatprep.subr.bf16.mxu0 %v4532_v8  ;;  %v4540_v13 = vld [vmem:[#allocation7 + $0x284] ss:$16 sps:$4 sm:$0xff]   ;;  %v4543_v15 = vld [vmem:[#allocation7 + $0x280] ss:$16 sps:$4 sm:$0xff]  }
  0x88   :  { %1613 = vmatprep.subr.bf16.mxu1 %v4534_v9  ;;  %v4544_v16 = vld [vmem:[#allocation7 + $0x64] ss:$16 sps:$4 sm:$0xff]   ;;  %v4548_v18 = vld [vmem:[#allocation7 + $0x60] ss:$16 sps:$4 sm:$0xff]  }
  0x89   :  { %v4546_v17 = vld [vmem:[#allocation7 + $0x264] ss:$16 sps:$4 sm:$0xff]   ;;  %v4549_v19 = vld [vmem:[#allocation7 + $0x260] ss:$16 sps:$4 sm:$0xff]  }
  0x8a   :  { %1573 = vmatpush1.bf16.msra.mxu0 %v4536_v10  ;;  %v4550_v20 = vld [vmem:[#allocation7 + $0x44] ss:$16 sps:$4 sm:$0xff]   ;;  %v4554_v22 = vld [vmem:[#allocation7 + $0x40] ss:$16 sps:$4 sm:$0xff]  }
  0x8b   :  { %1614 = vmatpush1.bf16.msra.mxu1 %v4537_v11  ;;  %1574 = vmatprep.subr.bf16.mxu0 %v4538_v12  ;;  %v4552_v21 = vld [vmem:[#allocation7 + $0x244] ss:$16 sps:$4 sm:$0xff]   ;;  %v4555_v23 = vld [vmem:[#allocation7 + $0x240] ss:$16 sps:$4 sm:$0xff]  }
  0x8c   :  { %1615 = vmatprep.subr.bf16.mxu1 %v4540_v13  ;;  %v4556_v24 = vld [vmem:[#allocation7 + $0x24] ss:$16 sps:$4 sm:$0xff]   ;;  %v4560_v26 = vld [vmem:[#allocation7 + $0x20] ss:$16 sps:$4 sm:$0xff]  }
  0x8d   :  { %v4558_v25 = vld [vmem:[#allocation7 + $0x224] ss:$16 sps:$4 sm:$0xff]   ;;  %v4561_v27 = vld [vmem:[#allocation7 + $0x220] ss:$16 sps:$4 sm:$0xff]  }
  0x8e   :  { %1575 = vmatpush1.bf16.msra.mxu0 %v4542_v14  ;;  %v4562_v28 = vld [vmem:[#allocation7 + $0x4] ss:$16 sps:$4 sm:$0xff]   ;;  %v4566_v30 = vld [vmem:[#allocation7] ss:$16 sps:$4 sm:$0xff]  }
  0x8f   :  { %1616 = vmatpush1.bf16.msra.mxu1 %v4543_v15  ;;  %1576 = vmatprep.subr.bf16.mxu0 %v4544_v16  ;;  %v4564_v29 = vld [vmem:[#allocation7 + $0x204] ss:$16 sps:$4 sm:$0xff]   ;;  %v4567_v31 = vld [vmem:[#allocation7 + $0x200] ss:$16 sps:$4 sm:$0xff]  }
  0x90   :  { %1617 = vmatprep.subr.bf16.mxu1 %v4546_v17  ;;  %v4568_v32 = vld [vmem:[#allocation7 + $0x1e4] ss:$16 sps:$4 sm:$0xff]   ;;  %v4572_v34 = vld [vmem:[#allocation7 + $0x1e0] ss:$16 sps:$4 sm:$0xff]  }
  0x91   :  { %v4570_v33 = vld [vmem:[#allocation7 + $0x3e4] ss:$16 sps:$4 sm:$0xff]   ;;  %v4573_v35 = vld [vmem:[#allocation7 + $0x3e0] ss:$16 sps:$4 sm:$0xff]  }
  0x92   :  { %1577 = vmatpush1.bf16.msra.mxu0 %v4548_v18  ;;  %v4574_v36 = vld [vmem:[#allocation7 + $0x1c4] ss:$16 sps:$4 sm:$0xff]   ;;  %v4578_v38 = vld [vmem:[#allocation7 + $0x1c0] ss:$16 sps:$4 sm:$0xff]   ;;  %v5472_v18 = vmov 0  }
  0x93   :  { %1618 = vmatpush1.bf16.msra.mxu1 %v4549_v19  ;;  %1578 = vmatprep.subr.bf16.mxu0 %v4550_v20  ;;  %v4576_v37 = vld [vmem:[#allocation7 + $0x3c4] ss:$16 sps:$4 sm:$0xff]   ;;  %v4579_v39 = vld [vmem:[#allocation7 + $0x3c0] ss:$16 sps:$4 sm:$0xff]  }
  0x94   :  { %1619 = vmatprep.subr.bf16.mxu1 %v4552_v21  ;;  %v4580_v40 = vld [vmem:[#allocation7 + $0x1a4] ss:$16 sps:$4 sm:$0xff]   ;;  %v4584_v42 = vld [vmem:[#allocation7 + $0x1a0] ss:$16 sps:$4 sm:$0xff]  }
  0x95   :  { %v4582_v41 = vld [vmem:[#allocation7 + $0x3a4] ss:$16 sps:$4 sm:$0xff]   ;;  %v4585_v43 = vld [vmem:[#allocation7 + $0x3a0] ss:$16 sps:$4 sm:$0xff]  }
  0x96   :  { %1579 = vmatpush1.bf16.msra.mxu0 %v4554_v22  ;;  %v4586_v44 = vld [vmem:[#allocation7 + $0x184] ss:$16 sps:$4 sm:$0xff]   ;;  %v4590_v47 = vld [vmem:[#allocation7 + $0x180] ss:$16 sps:$4 sm:$0xff]  }
  0x97   :  { %1620 = vmatpush1.bf16.msra.mxu1 %v4555_v23  ;;  %1580 = vmatprep.subr.bf16.mxu0 %v4556_v24  ;;  %v4588_v45 = vld [vmem:[#allocation7 + $0x384] ss:$16 sps:$4 sm:$0xff]   ;;  %v4591_v48 = vld [vmem:[#allocation7 + $0x380] ss:$16 sps:$4 sm:$0xff]  }
  0x98   :  { %1621 = vmatprep.subr.bf16.mxu1 %v4558_v25  ;;  %v4592_v51 = vld [vmem:[#allocation7 + $0x164] ss:$16 sps:$4 sm:$0xff]   ;;  %v4596_v54 = vld [vmem:[#allocation7 + $0x160] ss:$16 sps:$4 sm:$0xff]  }
  0x99   :  { %v4594_v53 = vld [vmem:[#allocation7 + $0x364] ss:$16 sps:$4 sm:$0xff]   ;;  %v4597_v55 = vld [vmem:[#allocation7 + $0x360] ss:$16 sps:$4 sm:$0xff]  }
  0x9a   :  { %1581 = vmatpush1.bf16.msra.mxu0 %v4560_v26  ;;  %v4598_v56 = vld [vmem:[#allocation7 + $0x144] ss:$16 sps:$4 sm:$0xff]   ;;  %v4602_v58 = vld [vmem:[#allocation7 + $0x140] ss:$16 sps:$4 sm:$0xff]  }
  0x9b   :  { %1622 = vmatpush1.bf16.msra.mxu1 %v4561_v27  ;;  %1582 = vmatprep.subr.bf16.mxu0 %v4562_v28  ;;  %v4600_v57 = vld [vmem:[#allocation7 + $0x344] ss:$16 sps:$4 sm:$0xff]   ;;  %v4603_v59 = vld [vmem:[#allocation7 + $0x340] ss:$16 sps:$4 sm:$0xff]  }
  0x9c   :  { %1623 = vmatprep.subr.bf16.mxu1 %v4564_v29  ;;  %v4604_v60 = vld [vmem:[#allocation7 + $0x124] ss:$16 sps:$4 sm:$0xff]   ;;  %v4608_v62 = vld [vmem:[#allocation7 + $0x120] ss:$16 sps:$4 sm:$0xff]  }
  0x9d   :  { %v4606_v61 = vld [vmem:[#allocation7 + $0x324] ss:$16 sps:$4 sm:$0xff]   ;;  %v4609_v63 = vld [vmem:[#allocation7 + $0x320] ss:$16 sps:$4 sm:$0xff]  }
  0x9e   :  { %1583 = vmatpush1.bf16.msra.mxu0 %v4566_v30  ;;  %v4610_v0 = vld [vmem:[#allocation7 + $0x104] ss:$16 sps:$4 sm:$0xff]   ;;  %v4614_v2 = vld [vmem:[#allocation7 + $0x100] ss:$16 sps:$4 sm:$0xff]  }
  0x9f   :  { %1624 = vmatpush1.bf16.msra.mxu1 %v4567_v31  ;;  %1584 = vmatprep.subr.bf16.mxu0 %v4568_v32  ;;  %v4612_v1 = vld [vmem:[#allocation7 + $0x304] ss:$16 sps:$4 sm:$0xff]   ;;  %v4615_v3 = vld [vmem:[#allocation7 + $0x300] ss:$16 sps:$4 sm:$0xff]  }
  0xa0   :  { %1625 = vmatprep.subr.bf16.mxu1 %v4570_v33  ;;  %v188_v4 = vld [vmem:[#allocation2] sm:$0xff]  ;;  %v190_v5 = vld [vmem:[#allocation2 + $0x10] sm:$0xff] }
  0xa1   :  { %v4618_v6 = vld [vmem:[#allocation7 + $0x4e4] ss:$16 sps:$4 sm:$0xff]   ;;  %v5618_v8 = vpack.c.bf16 %v188_v4, %v188_v4  ;;  %v5620_v9 = vpack.c.bf16 %v190_v5, %v190_v5  ;;  %v4616_v10 = vld [vmem:[#allocation7 + $0x4e0] ss:$16 sps:$4 sm:$0xff]   ;;  %v4697_v5 = vld [vmem:[#allocation7 + $0x48] ss:$16 sps:$4 sm:$0xff]  }
  0xa2   :  { %1585 = vmatpush2.bf16.msra.mxu0 %v4572_v34  ;;  %v4621_v7 = vld [vmem:[#allocation7 + $0x6e4] ss:$16 sps:$4 sm:$0xff]   ;;  %v4619_v11 = vld [vmem:[#allocation7 + $0x6e0] ss:$16 sps:$4 sm:$0xff]  }
  0xa3   :  { %1626 = vmatpush2.bf16.msra.mxu1 %v4573_v35  ;;  %1586 = vmatprep.subr.bf16.mxu0 %v4574_v36  ;;  %v4624_v12 = vld [vmem:[#allocation7 + $0x4c4] ss:$16 sps:$4 sm:$0xff]   ;;  %v4622_v14 = vld [vmem:[#allocation7 + $0x4c0] ss:$16 sps:$4 sm:$0xff]   ;;  %v193_v36 = vld [vmem:[#allocation2 + $0x28] sm:$0xff] }
  0xa4   :  { %1627 = vmatprep.subr.bf16.mxu1 %v4576_v37  ;;  %v4627_v13 = vld [vmem:[#allocation7 + $0x6c4] ss:$16 sps:$4 sm:$0xff]   ;;  %v4625_v15 = vld [vmem:[#allocation7 + $0x6c0] ss:$16 sps:$4 sm:$0xff]  }
  0xa5   :  { %v4630_v16 = vld [vmem:[#allocation7 + $0x4a4] ss:$16 sps:$4 sm:$0xff]   ;;  %v4628_v19 = vld [vmem:[#allocation7 + $0x4a0] ss:$16 sps:$4 sm:$0xff]  }
  0xa6   :  { %1587 = vmatpush2.bf16.msra.mxu0 %v4578_v38  ;;  %v4633_v17 = vld [vmem:[#allocation7 + $0x6a4] ss:$16 sps:$4 sm:$0xff]   ;;  %v4631_v20 = vld [vmem:[#allocation7 + $0x6a0] ss:$16 sps:$4 sm:$0xff]  }
  0xa7   :  { %1628 = vmatpush2.bf16.msra.mxu1 %v4579_v39  ;;  %1588 = vmatprep.subr.bf16.mxu0 %v4580_v40  ;;  %v4636_v21 = vld [vmem:[#allocation7 + $0x484] ss:$16 sps:$4 sm:$0xff]   ;;  %v4634_v23 = vld [vmem:[#allocation7 + $0x480] ss:$16 sps:$4 sm:$0xff]   ;;  %v5625_v39 = vpack.c.bf16 %v193_v36, %v193_v36  ;;  %v4741_v36 = vld [vmem:[#allocation7 + $0x26c] ss:$16 sps:$4 sm:$0xff]  }
  0xa8   :  { %1629 = vmatprep.subr.bf16.mxu1 %v4582_v41  ;;  %v4639_v22 = vld [vmem:[#allocation7 + $0x684] ss:$16 sps:$4 sm:$0xff]   ;;  %v4637_v24 = vld [vmem:[#allocation7 + $0x680] ss:$16 sps:$4 sm:$0xff]  }
  0xa9   :  { %v4642_v25 = vld [vmem:[#allocation7 + $0x464] ss:$16 sps:$4 sm:$0xff]   ;;  %v4640_v27 = vld [vmem:[#allocation7 + $0x460] ss:$16 sps:$4 sm:$0xff]  }
  0xaa   :  { %1589 = vmatpush2.bf16.msra.mxu0 %v4584_v42  ;;  %v4645_v26 = vld [vmem:[#allocation7 + $0x664] ss:$16 sps:$4 sm:$0xff]   ;;  %v4643_v28 = vld [vmem:[#allocation7 + $0x660] ss:$16 sps:$4 sm:$0xff]  }
  0xab   :  { %1630 = vmatpush2.bf16.msra.mxu1 %v4585_v43  ;;  %1590 = vmatprep.subr.bf16.mxu0 %v4586_v44  ;;  %v4648_v29 = vld [vmem:[#allocation7 + $0x444] ss:$16 sps:$4 sm:$0xff]   ;;  %v4646_v31 = vld [vmem:[#allocation7 + $0x440] ss:$16 sps:$4 sm:$0xff]  }
  0xac   :  { %1631 = vmatprep.subr.bf16.mxu1 %v4588_v45  ;;  %v4651_v30 = vld [vmem:[#allocation7 + $0x644] ss:$16 sps:$4 sm:$0xff]   ;;  %v4649_v32 = vld [vmem:[#allocation7 + $0x640] ss:$16 sps:$4 sm:$0xff]   ;;  %v4669_v45 = vld [vmem:[#allocation7 + $0xec] ss:$16 sps:$4 sm:$0xff]  }
  0xad   :  { %v4654_v33 = vld [vmem:[#allocation7 + $0x424] ss:$16 sps:$4 sm:$0xff]   ;;  %v4652_v35 = vld [vmem:[#allocation7 + $0x420] ss:$16 sps:$4 sm:$0xff]  }
  0xae   :  { %1591 = vmatpush2.bf16.msra.mxu0 %v4590_v47  ;;  %v4657_v34 = vld [vmem:[#allocation7 + $0x624] ss:$16 sps:$4 sm:$0xff]   ;;  %v4655_v37 = vld [vmem:[#allocation7 + $0x620] ss:$16 sps:$4 sm:$0xff]  }
  0xaf   :  { %1632 = vmatpush2.bf16.msra.mxu1 %v4591_v48  ;;  %1592 = vmatprep.subr.bf16.mxu0 %v4592_v51  ;;  %v4660_v38 = vld [vmem:[#allocation7 + $0x404] ss:$16 sps:$4 sm:$0xff]   ;;  %v4658_v41 = vld [vmem:[#allocation7 + $0x400] ss:$16 sps:$4 sm:$0xff]   ;;  %v4667_v48 = vld [vmem:[#allocation7 + $0xe8] ss:$16 sps:$4 sm:$0xff]  }
  0xb0   :  { %1633 = vmatprep.subr.bf16.mxu1 %v4594_v53  ;;  %v4663_v40 = vld [vmem:[#allocation7 + $0x604] ss:$16 sps:$4 sm:$0xff]   ;;  %v4661_v42 = vld [vmem:[#allocation7 + $0x600] ss:$16 sps:$4 sm:$0xff]   ;;  %v4675_v51 = vld [vmem:[#allocation7 + $0xcc] ss:$16 sps:$4 sm:$0xff]  }
  0xb1   :  { %v4666_v43 = vld [vmem:[#allocation7 + $0x5e4] ss:$16 sps:$4 sm:$0xff]   ;;  %v4664_v46 = vld [vmem:[#allocation7 + $0x5e0] ss:$16 sps:$4 sm:$0xff]  }
  0xb2   :  { %1593 = vmatpush2.bf16.msra.mxu0 %v4596_v54  ;;  %v194_v44 = vld [vmem:[#allocation2 + $0x30] sm:$0xff]  ;;  %v4673_v54 = vld [vmem:[#allocation7 + $0xc8] ss:$16 sps:$4 sm:$0xff]  }
  0xb3   :  { %1634 = vmatpush2.bf16.msra.mxu1 %v4597_v55  ;;  %1594 = vmatprep.subr.bf16.mxu0 %v4598_v56  ;;  %v5628_v47 = vpack.c.bf16 %v194_v44, %v194_v44  ;;  %v4672_v50 = vld [vmem:[#allocation7 + $0x5c4] ss:$16 sps:$4 sm:$0xff]   ;;  %v4670_v53 = vld [vmem:[#allocation7 + $0x5c0] ss:$16 sps:$4 sm:$0xff]   ;;  %v4681_v56 = vld [vmem:[#allocation7 + $0xac] ss:$16 sps:$4 sm:$0xff]  }
  0xb4   :  { %1635 = vmatprep.subr.bf16.mxu1 %v4600_v57  ;;  %v4678_v55 = vld [vmem:[#allocation7 + $0x5a4] ss:$16 sps:$4 sm:$0xff]   ;;  %v4676_v57 = vld [vmem:[#allocation7 + $0x5a0] ss:$16 sps:$4 sm:$0xff]   ;;  %v4753_v44 = vld [vmem:[#allocation7 + $0x22c] ss:$16 sps:$4 sm:$0xff]  }
  0xb5   :  { %v4694_v4 = vld [vmem:[#allocation7 + $0x540] ss:$16 sps:$4 sm:$0xff]  }
  0xb6   :  { %1595 = vmatpush2.bf16.msra.mxu0 %v4602_v58  ;;  %v4679_v58 = vld [vmem:[#allocation7 + $0xa8] ss:$16 sps:$4 sm:$0xff]  }
  0xb7   :  { %1636 = vmatpush2.bf16.msra.mxu1 %v4603_v59  ;;  %1596 = vmatprep.subr.bf16.mxu0 %v4604_v60  ;;  %v4684_v59 = vld [vmem:[#allocation7 + $0x584] ss:$16 sps:$4 sm:$0xff]   ;;  %v4687_v60 = vld [vmem:[#allocation7 + $0x8c] ss:$16 sps:$4 sm:$0xff]  }
  0xb8   :  { %1637 = vmatprep.subr.bf16.mxu1 %v4606_v61  ;;  %v4682_v61 = vld [vmem:[#allocation7 + $0x580] ss:$16 sps:$4 sm:$0xff]  }
  0xba   :  { %1597 = vmatpush2.bf16.msra.mxu0 %v4608_v62  ;;  %v4685_v62 = vld [vmem:[#allocation7 + $0x88] ss:$16 sps:$4 sm:$0xff]  }
  0xbb   :  { %1638 = vmatpush2.bf16.msra.mxu1 %v4609_v63  ;;  %1598 = vmatprep.subr.bf16.mxu0 %v4610_v0  ;;  %v4690_v63 = vld [vmem:[#allocation7 + $0x564] ss:$16 sps:$4 sm:$0xff]   ;;  %v4693_v0 = vld [vmem:[#allocation7 + $0x6c] ss:$16 sps:$4 sm:$0xff]  }
  0xbc   :  { %1639 = vmatprep.subr.bf16.mxu1 %v4612_v1  ;;  %v4688_v1 = vld [vmem:[#allocation7 + $0x560] ss:$16 sps:$4 sm:$0xff]  }
  0xbe   :  { %1599 = vmatpush2.bf16.msra.mxu0 %v4614_v2  ;;  %v4696_v2 = vld [vmem:[#allocation7 + $0x544] ss:$16 sps:$4 sm:$0xff]  }
  0xbf   :  { %1640 = vmatpush2.bf16.msra.mxu1 %v4615_v3  ;;  %1650 = vmatprep.subr.bf16.mxu0 %v4618_v6  ;;  %v4699_v3 = vld [vmem:[#allocation7 + $0x4c] ss:$16 sps:$4 sm:$0xff]   ;;  %v4702_v6 = vld [vmem:[#allocation7 + $0x524] ss:$16 sps:$4 sm:$0xff]  }
  0xc0   :  { %1691 = vmatprep.subr.bf16.mxu1 %v4621_v7  ;;  %v4705_v7 = vld [vmem:[#allocation7 + $0x2c] ss:$16 sps:$4 sm:$0xff]  }
  0xc1   :  { %1601 = vmatmul.mubr.bf16.vlgmr.msra.gmra.mxu0 %v5618_v8 }
  0xc2   :  { %1642 = vmatmul.mubr.bf16.vlgmr.msra.gmra.mxu1 %v5620_v9  ;;  %1651 = vmatpush1.bf16.msra.mxu0 %v4616_v10  ;;  %v4700_v10 = vld [vmem:[#allocation7 + $0x520] ss:$16 sps:$4 sm:$0xff]  }
  0xc3   :  { %1692 = vmatpush1.bf16.msra.mxu1 %v4619_v11  ;;  %1652 = vmatprep.subr.bf16.mxu0 %v4624_v12  ;;  %v4703_v11 = vld [vmem:[#allocation7 + $0x28] ss:$16 sps:$4 sm:$0xff]   ;;  %v4708_v12 = vld [vmem:[#allocation7 + $0x504] ss:$16 sps:$4 sm:$0xff]  }
  0xc4   :  { %1693 = vmatprep.subr.bf16.mxu1 %v4627_v13  ;;  %1723 = vmatprep.mubr.bf16.mxu1 %v5472_v18  ;;  %v4711_v13 = vld [vmem:[#allocation7 + $0xc] ss:$16 sps:$4 sm:$0xff]  }
  0xc5   :  { %1682 = vmatprep.mubr.bf16.mxu0 %v5625_v39 }
  0xc6   :  { %1653 = vmatpush1.bf16.msra.mxu0 %v4622_v14  ;;  %v4706_v14 = vld [vmem:[#allocation7 + $0x500] ss:$16 sps:$4 sm:$0xff]  }
  0xc7   :  { %1694 = vmatpush1.bf16.msra.mxu1 %v4625_v15  ;;  %1654 = vmatprep.subr.bf16.mxu0 %v4630_v16  ;;  %v4709_v15 = vld [vmem:[#allocation7 + $0x8] ss:$16 sps:$4 sm:$0xff]   ;;  %v192_v16 = vld [vmem:[#allocation2 + $0x20] sm:$0xff] }
  0xc8   :  { %1695 = vmatprep.subr.bf16.mxu1 %v4633_v17  ;;  %v4714_v17 = vld [vmem:[#allocation7 + $0x1ec] ss:$16 sps:$4 sm:$0xff]  }
  0xca   :  { %1655 = vmatpush1.bf16.msra.mxu0 %v4628_v19  ;;  %v4717_v19 = vld [vmem:[#allocation7 + $0x2ec] ss:$16 sps:$4 sm:$0xff]  }
  0xcb   :  { %1696 = vmatpush1.bf16.msra.mxu1 %v4631_v20  ;;  %1656 = vmatprep.subr.bf16.mxu0 %v4636_v21  ;;  %v5632_v20 = vpack.c.bf16 %v192_v16, %v192_v16  ;;  %v4712_v21 = vld [vmem:[#allocation7 + $0x1e8] ss:$16 sps:$4 sm:$0xff]  }
  0xcc   :  { %1697 = vmatprep.subr.bf16.mxu1 %v4639_v22  ;;  %v4715_v22 = vld [vmem:[#allocation7 + $0x2e8] ss:$16 sps:$4 sm:$0xff]  }
  0xcd   :  { %v4799_v16 = vld [vmem:[#allocation7 + $0x428] ss:$16 sps:$4 sm:$0xff]  }
  0xce   :  { %1657 = vmatpush1.bf16.msra.mxu0 %v4634_v23  ;;  %v4720_v23 = vld [vmem:[#allocation7 + $0x1cc] ss:$16 sps:$4 sm:$0xff]  }
  0xcf   :  { %1698 = vmatpush1.bf16.msra.mxu1 %v4637_v24  ;;  %1658 = vmatprep.subr.bf16.mxu0 %v4642_v25  ;;  %v4723_v24 = vld [vmem:[#allocation7 + $0x2cc] ss:$16 sps:$4 sm:$0xff]   ;;  %v4718_v25 = vld [vmem:[#allocation7 + $0x1c8] ss:$16 sps:$4 sm:$0xff]  }
  0xd0   :  { %1699 = vmatprep.subr.bf16.mxu1 %v4645_v26  ;;  %v4721_v26 = vld [vmem:[#allocation7 + $0x2c8] ss:$16 sps:$4 sm:$0xff]  }
  0xd2   :  { %1659 = vmatpush1.bf16.msra.mxu0 %v4640_v27  ;;  %v4726_v27 = vld [vmem:[#allocation7 + $0x1ac] ss:$16 sps:$4 sm:$0xff]  }
  0xd3   :  { %1700 = vmatpush1.bf16.msra.mxu1 %v4643_v28  ;;  %1660 = vmatprep.subr.bf16.mxu0 %v4648_v29  ;;  %v4729_v28 = vld [vmem:[#allocation7 + $0x2ac] ss:$16 sps:$4 sm:$0xff]   ;;  %v4724_v29 = vld [vmem:[#allocation7 + $0x1a8] ss:$16 sps:$4 sm:$0xff]  }
  0xd4   :  { %1701 = vmatprep.subr.bf16.mxu1 %v4651_v30  ;;  %v4727_v30 = vld [vmem:[#allocation7 + $0x2a8] ss:$16 sps:$4 sm:$0xff]  }
  0xd6   :  { %1661 = vmatpush1.bf16.msra.mxu0 %v4646_v31  ;;  %v4732_v31 = vld [vmem:[#allocation7 + $0x18c] ss:$16 sps:$4 sm:$0xff]  }
  0xd7   :  { %1702 = vmatpush1.bf16.msra.mxu1 %v4649_v32  ;;  %1662 = vmatprep.subr.bf16.mxu0 %v4654_v33  ;;  %v4735_v32 = vld [vmem:[#allocation7 + $0x28c] ss:$16 sps:$4 sm:$0xff]   ;;  %v4730_v33 = vld [vmem:[#allocation7 + $0x188] ss:$16 sps:$4 sm:$0xff]  }
  0xd8   :  { %1703 = vmatprep.subr.bf16.mxu1 %v4657_v34  ;;  %v4733_v34 = vld [vmem:[#allocation7 + $0x288] ss:$16 sps:$4 sm:$0xff]  }
  0xda   :  { %1663 = vmatpush1.bf16.msra.mxu0 %v4652_v35  ;;  %v4738_v35 = vld [vmem:[#allocation7 + $0x16c] ss:$16 sps:$4 sm:$0xff]  }
  0xdb   :  { %1704 = vmatpush1.bf16.msra.mxu1 %v4655_v37  ;;  %1664 = vmatprep.subr.bf16.mxu0 %v4660_v38  ;;  %v4736_v37 = vld [vmem:[#allocation7 + $0x168] ss:$16 sps:$4 sm:$0xff]   ;;  %v4744_v38 = vld [vmem:[#allocation7 + $0x14c] ss:$16 sps:$4 sm:$0xff]  }
  0xdc   :  { %1705 = vmatprep.subr.bf16.mxu1 %v4663_v40  ;;  %v4747_v40 = vld [vmem:[#allocation7 + $0x24c] ss:$16 sps:$4 sm:$0xff]  }
  0xde   :  { %1665 = vmatpush1.bf16.msra.mxu0 %v4658_v41  ;;  %v4742_v41 = vld [vmem:[#allocation7 + $0x148] ss:$16 sps:$4 sm:$0xff]  }
  0xdf   :  { %1706 = vmatpush1.bf16.msra.mxu1 %v4661_v42  ;;  %1666 = vmatprep.subr.bf16.mxu0 %v4666_v43  ;;  %v4745_v42 = vld [vmem:[#allocation7 + $0x248] ss:$16 sps:$4 sm:$0xff]   ;;  %v4750_v43 = vld [vmem:[#allocation7 + $0x12c] ss:$16 sps:$4 sm:$0xff]  }
  0xe0   :  { %1732 = vmatprep.subr.bf16.mxu1 %v4669_v45  ;;  %v4748_v45 = vld [vmem:[#allocation7 + $0x128] ss:$16 sps:$4 sm:$0xff]  }
  0xe2   :  { %1724 = vmatmul.mubr.bf16.vlgmr.msra.gmra.mxu1 %v5628_v47  ;;  %1667 = vmatpush2.bf16.msra.mxu0 %v4664_v46  ;;  %v4751_v46 = vld [vmem:[#allocation7 + $0x228] ss:$16 sps:$4 sm:$0xff]  }
  0xe3   :  { %1733 = vmatpush1.bf16.msra.mxu1 %v4667_v48  ;;  %1668 = vmatprep.subr.bf16.mxu0 %v4672_v50  ;;  %v4756_v48 = vld [vmem:[#allocation7 + $0x10c] ss:$16 sps:$4 sm:$0xff]  }
  0xe4   :  { %1734 = vmatprep.subr.bf16.mxu1 %v4675_v51  ;;  %1764 = vmatprep.mubr.bf16.mxu1 %v5612_v49  ;;  %v4691_v49 = vld [vmem:[#allocation7 + $0x68] ss:$16 sps:$4 sm:$0xff]   ;;  %v4759_v50 = vld [vmem:[#allocation7 + $0x20c] ss:$16 sps:$4 sm:$0xff]  }
  0xe5   :  { %v4754_v51 = vld [vmem:[#allocation7 + $0x108] ss:$16 sps:$4 sm:$0xff]  }
  0xe6   :  { %1669 = vmatpush2.bf16.msra.mxu0 %v4670_v53  ;;  %v4757_v53 = vld [vmem:[#allocation7 + $0x208] ss:$16 sps:$4 sm:$0xff]  }
  0xe7   :  { %1735 = vmatpush1.bf16.msra.mxu1 %v4673_v54  ;;  %1670 = vmatprep.subr.bf16.mxu0 %v4678_v55  ;;  %v4762_v54 = vld [vmem:[#allocation7 + $0x3ec] ss:$16 sps:$4 sm:$0xff]  }
  0xe8   :  { %1736 = vmatprep.subr.bf16.mxu1 %v4681_v56  ;;  %v4765_v55 = vld [vmem:[#allocation7 + $0x4ec] ss:$16 sps:$4 sm:$0xff]   ;;  %v4760_v56 = vld [vmem:[#allocation7 + $0x3e8] ss:$16 sps:$4 sm:$0xff]  }
  0xea   :  { %1671 = vmatpush2.bf16.msra.mxu0 %v4676_v57  ;;  %v4763_v57 = vld [vmem:[#allocation7 + $0x4e8] ss:$16 sps:$4 sm:$0xff]  }
  0xeb   :  { %1737 = vmatpush1.bf16.msra.mxu1 %v4679_v58  ;;  %1672 = vmatprep.subr.bf16.mxu0 %v4684_v59  ;;  %v4768_v58 = vld [vmem:[#allocation7 + $0x3cc] ss:$16 sps:$4 sm:$0xff]  }
  0xec   :  { %1738 = vmatprep.subr.bf16.mxu1 %v4687_v60  ;;  %v4771_v59 = vld [vmem:[#allocation7 + $0x4cc] ss:$16 sps:$4 sm:$0xff]   ;;  %v4766_v60 = vld [vmem:[#allocation7 + $0x3c8] ss:$16 sps:$4 sm:$0xff]  }
  0xee   :  { %1673 = vmatpush2.bf16.msra.mxu0 %v4682_v61  ;;  %v4769_v61 = vld [vmem:[#allocation7 + $0x4c8] ss:$16 sps:$4 sm:$0xff]  }
  0xef   :  { %1739 = vmatpush1.bf16.msra.mxu1 %v4685_v62  ;;  %1674 = vmatprep.subr.bf16.mxu0 %v4690_v63  ;;  %v4774_v62 = vld [vmem:[#allocation7 + $0x3ac] ss:$16 sps:$4 sm:$0xff]  }
  0xf0   :  { %1740 = vmatprep.subr.bf16.mxu1 %v4693_v0  ;;  %v4777_v63 = vld [vmem:[#allocation7 + $0x4ac] ss:$16 sps:$4 sm:$0xff]   ;;  %v4772_v0 = vld [vmem:[#allocation7 + $0x3a8] ss:$16 sps:$4 sm:$0xff]  }
  0xf2   :  { %1675 = vmatpush2.bf16.msra.mxu0 %v4688_v1  ;;  %v4775_v1 = vld [vmem:[#allocation7 + $0x4a8] ss:$16 sps:$4 sm:$0xff]  }
  0xf3   :  { %1741 = vmatpush1.bf16.msra.mxu1 %v4691_v49  ;;  %1676 = vmatprep.subr.bf16.mxu0 %v4696_v2  ;;  %v4780_v49 = vld [vmem:[#allocation7 + $0x38c] ss:$16 sps:$4 sm:$0xff]  }
  0xf4   :  { %1742 = vmatprep.subr.bf16.mxu1 %v4699_v3  ;;  %v4783_v2 = vld [vmem:[#allocation7 + $0x48c] ss:$16 sps:$4 sm:$0xff]   ;;  %v4778_v3 = vld [vmem:[#allocation7 + $0x388] ss:$16 sps:$4 sm:$0xff]  }
  0xf6   :  { %1677 = vmatpush2.bf16.msra.mxu0 %v4694_v4  ;;  %v4786_v4 = vld [vmem:[#allocation7 + $0x36c] ss:$16 sps:$4 sm:$0xff]  }
  0xf7   :  { %1743 = vmatpush1.bf16.msra.mxu1 %v4697_v5  ;;  %1678 = vmatprep.subr.bf16.mxu0 %v4702_v6  ;;  %v4789_v5 = vld [vmem:[#allocation7 + $0x46c] ss:$16 sps:$4 sm:$0xff]   ;;  %v4784_v6 = vld [vmem:[#allocation7 + $0x368] ss:$16 sps:$4 sm:$0xff]  }
  0xf8   :  { %1744 = vmatprep.subr.bf16.mxu1 %v4705_v7  ;;  %v4787_v7 = vld [vmem:[#allocation7 + $0x468] ss:$16 sps:$4 sm:$0xff]  }
  0xfa   :  { %1679 = vmatpush2.bf16.msra.mxu0 %v4700_v10  ;;  %v4792_v10 = vld [vmem:[#allocation7 + $0x34c] ss:$16 sps:$4 sm:$0xff]  }
  0xfb   :  { %1745 = vmatpush1.bf16.msra.mxu1 %v4703_v11  ;;  %1680 = vmatprep.subr.bf16.mxu0 %v4708_v12  ;;  %v4795_v11 = vld [vmem:[#allocation7 + $0x44c] ss:$16 sps:$4 sm:$0xff]   ;;  %v4793_v12 = vld [vmem:[#allocation7 + $0x448] ss:$16 sps:$4 sm:$0xff]  }
  0xfc   :  { %1746 = vmatprep.subr.bf16.mxu1 %v4711_v13  ;;  %v4798_v13 = vld [vmem:[#allocation7 + $0x32c] ss:$16 sps:$4 sm:$0xff]  }
  0xfe   :  { %1681 = vmatpush2.bf16.msra.mxu0 %v4706_v14  ;;  %v4801_v14 = vld [vmem:[#allocation7 + $0x42c] ss:$16 sps:$4 sm:$0xff]  }
  0xff   :  { %1747 = vmatpush1.bf16.msra.mxu1 %v4709_v15  ;;  %1773 = vmatprep.subr.bf16.mxu0 %v4717_v19  ;;  %v4796_v15 = vld [vmem:[#allocation7 + $0x328] ss:$16 sps:$4 sm:$0xff]   ;;  %v4807_v19 = vld [vmem:[#allocation7 + $0x40c] ss:$16 sps:$4 sm:$0xff]  }
 0x100   :  { %1748 = vmatprep.subr.bf16.mxu1 %v4714_v17  ;;  %v4804_v17 = vld [vmem:[#allocation7 + $0x30c] ss:$16 sps:$4 sm:$0xff]  }
 0x101   :  { %1683 = vmatmul.mubr.bf16.vlgmr.msra.gmra.mxu0 %v5632_v20 }
 0x102   :  { %1774 = vmatpush1.bf16.msra.mxu0 %v4715_v22  ;;  %1805 = vmatprep.mubr.bf16.mxu0 %v5614_v52  ;;  %v4739_v52 = vld [vmem:[#allocation7 + $0x268] ss:$16 sps:$4 sm:$0xff]  }
 0x103   :  { %1749 = vmatpush2.bf16.msra.mxu1 %v4712_v21  ;;  %1775 = vmatprep.subr.bf16.mxu0 %v4723_v24  ;;  %v4802_v21 = vld [vmem:[#allocation7 + $0x308] ss:$16 sps:$4 sm:$0xff]   ;;  %v4813_v24 = vld [vmem:[#allocation7 + $0x6ec] ss:$16 sps:$4 sm:$0xff]  }
 0x104   :  { %1750 = vmatprep.subr.bf16.mxu1 %v4720_v23  ;;  %v4805_v22 = vld [vmem:[#allocation7 + $0x408] ss:$16 sps:$4 sm:$0xff]   ;;  %v4810_v23 = vld [vmem:[#allocation7 + $0x5ec] ss:$16 sps:$4 sm:$0xff]  }
 0x106   :  { %1776 = vmatpush1.bf16.msra.mxu0 %v4721_v26  ;;  %v4811_v26 = vld [vmem:[#allocation7 + $0x6e8] ss:$16 sps:$4 sm:$0xff]  }
 0x107   :  { %1751 = vmatpush2.bf16.msra.mxu1 %v4718_v25  ;;  %1777 = vmatprep.subr.bf16.mxu0 %v4729_v28  ;;  %v4808_v25 = vld [vmem:[#allocation7 + $0x5e8] ss:$16 sps:$4 sm:$0xff]   ;;  %v4819_v28 = vld [vmem:[#allocation7 + $0x6cc] ss:$16 sps:$4 sm:$0xff]  }
 0x108   :  { %1752 = vmatprep.subr.bf16.mxu1 %v4726_v27  ;;  %v4816_v27 = vld [vmem:[#allocation7 + $0x5cc] ss:$16 sps:$4 sm:$0xff]  }
 0x10a   :  { %1778 = vmatpush1.bf16.msra.mxu0 %v4727_v30  ;;  %v4817_v30 = vld [vmem:[#allocation7 + $0x6c8] ss:$16 sps:$4 sm:$0xff]  }
 0x10b   :  { %1753 = vmatpush2.bf16.msra.mxu1 %v4724_v29  ;;  %1779 = vmatprep.subr.bf16.mxu0 %v4735_v32  ;;  %v4814_v29 = vld [vmem:[#allocation7 + $0x5c8] ss:$16 sps:$4 sm:$0xff]   ;;  %v4825_v32 = vld [vmem:[#allocation7 + $0x6ac] ss:$16 sps:$4 sm:$0xff]  }
 0x10c   :  { %1754 = vmatprep.subr.bf16.mxu1 %v4732_v31  ;;  %v4822_v31 = vld [vmem:[#allocation7 + $0x5ac] ss:$16 sps:$4 sm:$0xff]  }
 0x10e   :  { %1780 = vmatpush1.bf16.msra.mxu0 %v4733_v34  ;;  %v4823_v34 = vld [vmem:[#allocation7 + $0x6a8] ss:$16 sps:$4 sm:$0xff]  }
 0x10f   :  { %1755 = vmatpush2.bf16.msra.mxu1 %v4730_v33  ;;  %1781 = vmatprep.subr.bf16.mxu0 %v4741_v36  ;;  %v4820_v33 = vld [vmem:[#allocation7 + $0x5a8] ss:$16 sps:$4 sm:$0xff]   ;;  %v4831_v36 = vld [vmem:[#allocation7 + $0x68c] ss:$16 sps:$4 sm:$0xff]  }
 0x110   :  { %1756 = vmatprep.subr.bf16.mxu1 %v4738_v35  ;;  %v4828_v35 = vld [vmem:[#allocation7 + $0x58c] ss:$16 sps:$4 sm:$0xff]  }
 0x112   :  { %1782 = vmatpush1.bf16.msra.mxu0 %v4739_v52  ;;  %v4829_v52 = vld [vmem:[#allocation7 + $0x688] ss:$16 sps:$4 sm:$0xff]  }
 0x113   :  { %1757 = vmatpush2.bf16.msra.mxu1 %v4736_v37  ;;  %1783 = vmatprep.subr.bf16.mxu0 %v4747_v40  ;;  %v4826_v37 = vld [vmem:[#allocation7 + $0x588] ss:$16 sps:$4 sm:$0xff]  }
 0x114   :  { %1758 = vmatprep.subr.bf16.mxu1 %v4744_v38  ;;  %v4834_v38 = vld [vmem:[#allocation7 + $0x56c] ss:$16 sps:$4 sm:$0xff]   ;;  %v4832_v40 = vld [vmem:[#allocation7 + $0x568] ss:$16 sps:$4 sm:$0xff]  }
 0x116   :  { %1784 = vmatpush1.bf16.msra.mxu0 %v4745_v42  ;;  %v4840_v42 = vld [vmem:[#allocation7 + $0x54c] ss:$16 sps:$4 sm:$0xff]  }
 0x117   :  { %1759 = vmatpush2.bf16.msra.mxu1 %v4742_v41  ;;  %1785 = vmatprep.subr.bf16.mxu0 %v4753_v44  ;;  %v4835_v41 = vld [vmem:[#allocation7 + $0x668] ss:$16 sps:$4 sm:$0xff]  }
 0x118   :  { %1760 = vmatprep.subr.bf16.mxu1 %v4750_v43  ;;  %v4843_v43 = vld [vmem:[#allocation7 + $0x64c] ss:$16 sps:$4 sm:$0xff]   ;;  %v4838_v44 = vld [vmem:[#allocation7 + $0x548] ss:$16 sps:$4 sm:$0xff]  }
 0x11a   :  { %1786 = vmatpush1.bf16.msra.mxu0 %v4751_v46  ;;  %v4846_v46 = vld [vmem:[#allocation7 + $0x52c] ss:$16 sps:$4 sm:$0xff]  }
 0x11b   :  { %1761 = vmatpush2.bf16.msra.mxu1 %v4748_v45  ;;  %1787 = vmatprep.subr.bf16.mxu0 %v4759_v50  ;;  %v4841_v45 = vld [vmem:[#allocation7 + $0x648] ss:$16 sps:$4 sm:$0xff]  }
 0x11c   :  { %1762 = vmatprep.subr.bf16.mxu1 %v4756_v48  ;;  %v4849_v48 = vld [vmem:[#allocation7 + $0x62c] ss:$16 sps:$4 sm:$0xff]   ;;  %v4844_v50 = vld [vmem:[#allocation7 + $0x528] ss:$16 sps:$4 sm:$0xff]  }
 0x11e   :  { %1788 = vmatpush1.bf16.msra.mxu0 %v4757_v53  ;;  %v4852_v53 = vld [vmem:[#allocation7 + $0x50c] ss:$16 sps:$4 sm:$0xff]  }
 0x11f   :  { %1763 = vmatpush2.bf16.msra.mxu1 %v4754_v51  ;;  %1789 = vmatprep.subr.bf16.mxu0 %v4762_v54  ;;  %v4847_v51 = vld [vmem:[#allocation7 + $0x628] ss:$16 sps:$4 sm:$0xff]   ;;  %v4855_v54 = vld [vmem:[#allocation7 + $0x60c] ss:$16 sps:$4 sm:$0xff]  }
 0x120   :  { %1814 = vmatprep.subr.bf16.mxu1 %v4765_v55  ;;  %v4850_v55 = vld [vmem:[#allocation7 + $0x508] ss:$16 sps:$4 sm:$0xff]  }
 0x122   :  { %1765 = vmatmul.mubr.bf16.vlgmr.msra.gmra.mxu1 %v5618_v8  ;;  %1790 = vmatpush2.bf16.msra.mxu0 %v4760_v56  ;;  %v4781_v8 = vld [vmem:[#allocation7 + $0x488] ss:$16 sps:$4 sm:$0xff]  }
 0x123   :  { %1815 = vmatpush1.bf16.msra.mxu1 %v4763_v57  ;;  %1791 = vmatprep.subr.bf16.mxu0 %v4768_v58  ;;  %v4853_v56 = vld [vmem:[#allocation7 + $0x608] ss:$16 sps:$4 sm:$0xff]   ;;  %v4858_v57 = vld [vmem:[#allocation8 + $0x74] ss:$8 sps:$4 sm:$0xff]  }
 0x124   :  { %1816 = vmatprep.subr.bf16.mxu1 %v4771_v59  ;;  %1846 = vmatprep.mubr.bf16.mxu1 %v5625_v39  ;;  %v4790_v39 = vld [vmem:[#allocation7 + $0x348] ss:$16 sps:$4 sm:$0xff]   ;;  %v4861_v59 = vld [vmem:[#allocation8 + $0x64] ss:$8 sps:$4 sm:$0xff]  }
 0x125   :  { %v4856_v58 = vld [vmem:[#allocation8 + $0x70] ss:$8 sps:$4 sm:$0xff]  }
 0x126   :  { %1792 = vmatpush2.bf16.msra.mxu0 %v4766_v60  ;;  %v4859_v60 = vld [vmem:[#allocation8 + $0x60] ss:$8 sps:$4 sm:$0xff]  }
 0x127   :  { %1817 = vmatpush1.bf16.msra.mxu1 %v4769_v61  ;;  %1793 = vmatprep.subr.bf16.mxu0 %v4774_v62  ;;  %v4864_v61 = vld [vmem:[#allocation8 + $0x54] ss:$8 sps:$4 sm:$0xff]   ;;  %v4862_v62 = vld [vmem:[#allocation8 + $0x50] ss:$8 sps:$4 sm:$0xff]  }
 0x128   :  { %1818 = vmatprep.subr.bf16.mxu1 %v4777_v63  ;;  %v4867_v63 = vld [vmem:[#allocation8 + $0x44] ss:$8 sps:$4 sm:$0xff]  }
 0x12a   :  { %1794 = vmatpush2.bf16.msra.mxu0 %v4772_v0  ;;  %v4904_v0 = vld [vmem:[#allocation8 + $0x170] ss:$8 sps:$4 sm:$0xff]  }
 0x12b   :  { %1819 = vmatpush1.bf16.msra.mxu1 %v4775_v1  ;;  %1795 = vmatprep.subr.bf16.mxu0 %v4780_v49  ;;  %v4906_v1 = vld [vmem:[#allocation8 + $0x174] ss:$8 sps:$4 sm:$0xff]   ;;  %v4909_v49 = vld [vmem:[#allocation8 + $0x164] ss:$8 sps:$4 sm:$0xff]  }
 0x12c   :  { %1820 = vmatprep.subr.bf16.mxu1 %v4783_v2  ;;  %v4865_v2 = vld [vmem:[#allocation8 + $0x40] ss:$8 sps:$4 sm:$0xff]  }
 0x12e   :  { %1796 = vmatpush2.bf16.msra.mxu0 %v4778_v3  ;;  %v4870_v3 = vld [vmem:[#allocation8 + $0x34] ss:$8 sps:$4 sm:$0xff]  }
 0x12f   :  { %1821 = vmatpush1.bf16.msra.mxu1 %v4781_v8  ;;  %1797 = vmatprep.subr.bf16.mxu0 %v4786_v4  ;;  %v4907_v8 = vld [vmem:[#allocation8 + $0x160] ss:$8 sps:$4 sm:$0xff]   ;;  %v4912_v4 = vld [vmem:[#allocation8 + $0x154] ss:$8 sps:$4 sm:$0xff]  }
 0x130   :  { %1822 = vmatprep.subr.bf16.mxu1 %v4789_v5  ;;  %v4873_v5 = vld [vmem:[#allocation8 + $0x24] ss:$8 sps:$4 sm:$0xff]  }
 0x132   :  { %1798 = vmatpush2.bf16.msra.mxu0 %v4784_v6  ;;  %v4915_v6 = vld [vmem:[#allocation8 + $0x144] ss:$8 sps:$4 sm:$0xff]  }
 0x133   :  { %1823 = vmatpush1.bf16.msra.mxu1 %v4787_v7  ;;  %1799 = vmatprep.subr.bf16.mxu0 %v4792_v10  ;;  %v4871_v7 = vld [vmem:[#allocation8 + $0x20] ss:$8 sps:$4 sm:$0xff]  }
 0x134   :  { %1824 = vmatprep.subr.bf16.mxu1 %v4795_v11  ;;  %v4913_v10 = vld [vmem:[#allocation8 + $0x140] ss:$8 sps:$4 sm:$0xff]   ;;  %v4876_v11 = vld [vmem:[#allocation8 + $0x14] ss:$8 sps:$4 sm:$0xff]  }
 0x136   :  { %1800 = vmatpush2.bf16.msra.mxu0 %v4790_v39  ;;  %v4918_v39 = vld [vmem:[#allocation8 + $0x134] ss:$8 sps:$4 sm:$0xff]  }
 0x137   :  { %1825 = vmatpush1.bf16.msra.mxu1 %v4793_v12  ;;  %1801 = vmatprep.subr.bf16.mxu0 %v4798_v13  ;;  %v4874_v12 = vld [vmem:[#allocation8 + $0x10] ss:$8 sps:$4 sm:$0xff]  }
 0x138   :  { %1826 = vmatprep.subr.bf16.mxu1 %v4801_v14  ;;  %v4916_v13 = vld [vmem:[#allocation8 + $0x130] ss:$8 sps:$4 sm:$0xff]   ;;  %v4879_v14 = vld [vmem:[#allocation8 + $0x4] ss:$8 sps:$4 sm:$0xff]  }
 0x13a   :  { %1802 = vmatpush2.bf16.msra.mxu0 %v4796_v15  ;;  %v4877_v15 = vld [vmem:[#allocation8] ss:$8 sps:$4 sm:$0xff]  }
 0x13b   :  { %1827 = vmatpush1.bf16.msra.mxu1 %v4799_v16  ;;  %1803 = vmatprep.subr.bf16.mxu0 %v4804_v17  ;;  %v4882_v16 = vld [vmem:[#allocation8 + $0xf4] ss:$8 sps:$4 sm:$0xff]   ;;  %v4880_v17 = vld [vmem:[#allocation8 + $0xf0] ss:$8 sps:$4 sm:$0xff]  }
 0x13c   :  { %1828 = vmatprep.subr.bf16.mxu1 %v4807_v19  ;;  %v4885_v19 = vld [vmem:[#allocation8 + $0xe4] ss:$8 sps:$4 sm:$0xff]  }
 0x13e   :  { %1804 = vmatpush2.bf16.msra.mxu0 %v4802_v21  ;;  %v4921_v21 = vld [vmem:[#allocation8 + $0x124] ss:$8 sps:$4 sm:$0xff]  }
 0x13f   :  { %1829 = vmatpush1.bf16.msra.mxu1 %v4805_v22  ;;  %1855 = vmatprep.subr.bf16.mxu0 %v4813_v24  ;;  %v4919_v22 = vld [vmem:[#allocation8 + $0x120] ss:$8 sps:$4 sm:$0xff]  }
 0x140   :  { %1830 = vmatprep.subr.bf16.mxu1 %v4810_v23 }
 0x141   :  { %1806 = vmatmul.mubr.bf16.vlgmr.msra.gmra.mxu0 %v5620_v9  ;;  %v4837_v9 = vld [vmem:[#allocation7 + $0x66c] ss:$16 sps:$4 sm:$0xff]  }
 0x142   :  { %1856 = vmatpush1.bf16.msra.mxu0 %v4811_v26  ;;  %1887 = vmatprep.mubr.bf16.mxu0 %v5472_v18 }
 0x143   :  { %1831 = vmatpush2.bf16.msra.mxu1 %v4808_v25  ;;  %1857 = vmatprep.subr.bf16.mxu0 %v4819_v28  ;;  %v4883_v25 = vld [vmem:[#allocation8 + $0xe0] ss:$8 sps:$4 sm:$0xff]   ;;  %v4888_v28 = vld [vmem:[#allocation8 + $0xd4] ss:$8 sps:$4 sm:$0xff]  }
 0x144   :  { %1832 = vmatprep.subr.bf16.mxu1 %v4816_v27 }
 0x146   :  { %1858 = vmatpush1.bf16.msra.mxu0 %v4817_v30  ;;  %v4922_v30 = vld [vmem:[#allocation8 + $0x110] ss:$8 sps:$4 sm:$0xff]  }
 0x147   :  { %1833 = vmatpush2.bf16.msra.mxu1 %v4814_v29  ;;  %1859 = vmatprep.subr.bf16.mxu0 %v4825_v32  ;;  %v4924_v29 = vld [vmem:[#allocation8 + $0x114] ss:$8 sps:$4 sm:$0xff]  }
 0x148   :  { %1834 = vmatprep.subr.bf16.mxu1 %v4822_v31 }
 0x14a   :  { %1860 = vmatpush1.bf16.msra.mxu0 %v4823_v34 }
 0x14b   :  { %1835 = vmatpush2.bf16.msra.mxu1 %v4820_v33  ;;  %1861 = vmatprep.subr.bf16.mxu0 %v4831_v36  ;;  %v4886_v33 = vld [vmem:[#allocation8 + $0xd0] ss:$8 sps:$4 sm:$0xff]   ;;  %v4891_v36 = vld [vmem:[#allocation8 + $0xc4] ss:$8 sps:$4 sm:$0xff]  }
 0x14c   :  { %1836 = vmatprep.subr.bf16.mxu1 %v4828_v35 }
 0x14e   :  { %1862 = vmatpush1.bf16.msra.mxu0 %v4829_v52  ;;  %v4927_v52 = vld [vmem:[#allocation8 + $0x104] ss:$8 sps:$4 sm:$0xff]  }
 0x14f   :  { %1837 = vmatpush2.bf16.msra.mxu1 %v4826_v37  ;;  %1863 = vmatprep.subr.bf16.mxu0 %v4837_v9  ;;  %v4925_v37 = vld [vmem:[#allocation8 + $0x100] ss:$8 sps:$4 sm:$0xff]  }
 0x150   :  { %1838 = vmatprep.subr.bf16.mxu1 %v4834_v38  ;;  %v4930_v38 = vld [vmem:[#allocation8 + $0x1f4] ss:$8 sps:$4 sm:$0xff]   ;;  %v4889_v9 = vld [vmem:[#allocation8 + $0xc0] ss:$8 sps:$4 sm:$0xff]  }
 0x152   :  { %1864 = vmatpush1.bf16.msra.mxu0 %v4835_v41  ;;  %v4894_v41 = vld [vmem:[#allocation8 + $0xb4] ss:$8 sps:$4 sm:$0xff]  }
 0x153   :  { %1839 = vmatpush2.bf16.msra.mxu1 %v4832_v40  ;;  %1865 = vmatprep.subr.bf16.mxu0 %v4843_v43  ;;  %v4928_v40 = vld [vmem:[#allocation8 + $0x1f0] ss:$8 sps:$4 sm:$0xff]  }
 0x154   :  { %1840 = vmatprep.subr.bf16.mxu1 %v4840_v42  ;;  %v4933_v42 = vld [vmem:[#allocation8 + $0x1e4] ss:$8 sps:$4 sm:$0xff]   ;;  %v4892_v43 = vld [vmem:[#allocation8 + $0xb0] ss:$8 sps:$4 sm:$0xff]  }
 0x156   :  { %1866 = vmatpush1.bf16.msra.mxu0 %v4841_v45  ;;  %v4897_v45 = vld [vmem:[#allocation8 + $0xa4] ss:$8 sps:$4 sm:$0xff]  }
 0x157   :  { %1841 = vmatpush2.bf16.msra.mxu1 %v4838_v44  ;;  %1867 = vmatprep.subr.bf16.mxu0 %v4849_v48  ;;  %v4931_v44 = vld [vmem:[#allocation8 + $0x1e0] ss:$8 sps:$4 sm:$0xff]  }
 0x158   :  { %1842 = vmatprep.subr.bf16.mxu1 %v4846_v46  ;;  %v4936_v46 = vld [vmem:[#allocation8 + $0x1d4] ss:$8 sps:$4 sm:$0xff]   ;;  %v4895_v48 = vld [vmem:[#allocation8 + $0xa0] ss:$8 sps:$4 sm:$0xff]  }
 0x15a   :  { %1868 = vmatpush1.bf16.msra.mxu0 %v4847_v51  ;;  %v4900_v51 = vld [vmem:[#allocation8 + $0x94] ss:$8 sps:$4 sm:$0xff]  }
 0x15b   :  { %1843 = vmatpush2.bf16.msra.mxu1 %v4844_v50  ;;  %1869 = vmatprep.subr.bf16.mxu0 %v4855_v54  ;;  %v4934_v50 = vld [vmem:[#allocation8 + $0x1d0] ss:$8 sps:$4 sm:$0xff]  }
 0x15c   :  { %1844 = vmatprep.subr.bf16.mxu1 %v4852_v53  ;;  %v4939_v53 = vld [vmem:[#allocation8 + $0x1c4] ss:$8 sps:$4 sm:$0xff]   ;;  %v4898_v54 = vld [vmem:[#allocation8 + $0x90] ss:$8 sps:$4 sm:$0xff]  }
 0x15e   :  { %1870 = vmatpush1.bf16.msra.mxu0 %v4853_v56  ;;  %v4903_v56 = vld [vmem:[#allocation8 + $0x84] ss:$8 sps:$4 sm:$0xff]  }
 0x15f   :  { %1845 = vmatpush2.bf16.msra.mxu1 %v4850_v55  ;;  %2300 = vmatprep.subr.bf16.mxu0 %v4858_v57  ;;  %v4937_v55 = vld [vmem:[#allocation8 + $0x1c0] ss:$8 sps:$4 sm:$0xff]   ;;  %v4942_v57 = vld [vmem:[#allocation8 + $0x1b4] ss:$8 sps:$4 sm:$0xff]  }
 0x160   :  { %2341 = vmatprep.subr.bf16.mxu1 %v4906_v1  ;;  %v4946_v1 = vld [vmem:[#allocation8 + $0x190] ss:$8 sps:$4 sm:$0xff]  }
 0x161   :  { %1888 = vmatmul.mubr.bf16.vlgmr.msra.gmra.mxu0 %v5628_v47  ;;  %v4868_v47 = vld [vmem:[#allocation8 + $0x30] ss:$8 sps:$4 sm:$0xff]  }
 0x162   :  { %1847 = vmatmul.mubr.bf16.vlgmr.msra.gmra.mxu1 %v5632_v20  ;;  %2301 = vmatpush1.bf16.msra.mxu0 %v4856_v58  ;;  %v4910_v20 = vld [vmem:[#allocation8 + $0x150] ss:$8 sps:$4 sm:$0xff]   ;;  %v4901_v58 = vld [vmem:[#allocation8 + $0x80] ss:$8 sps:$4 sm:$0xff]  }
 0x163   :  { %2302 = vmatprep.subr.bf16.mxu0 %v4861_v59  ;;  %2342 = vmatpush1.bf16.msra.mxu1 %v4904_v0  ;;  %v4940_v59 = vld [vmem:[#allocation8 + $0x1b0] ss:$8 sps:$4 sm:$0xff]   ;;  %v4948_v0 = vld [vmem:[#allocation8 + $0x194] ss:$8 sps:$4 sm:$0xff]  }
 0x164   :  { %2343 = vmatprep.subr.bf16.mxu1 %v4909_v49 }
 0x166   :  { %2303 = vmatpush1.bf16.msra.mxu0 %v4859_v60  ;;  %v4945_v60 = vld [vmem:[#allocation8 + $0x1a4] ss:$8 sps:$4 sm:$0xff]  }
 0x167   :  { %2304 = vmatprep.subr.bf16.mxu0 %v4864_v61  ;;  %2344 = vmatpush1.bf16.msra.mxu1 %v4907_v8  ;;  %v4943_v61 = vld [vmem:[#allocation8 + $0x1a0] ss:$8 sps:$4 sm:$0xff]  }
 0x168   :  { %2345 = vmatprep.subr.bf16.mxu1 %v4912_v4  ;;  %v4949_v8 = vld [vmem:[#allocation8 + $0x180] ss:$8 sps:$4 sm:$0xff]   ;;  %v428_v4 = vlaneseq }
 0x16a   :  { %2305 = vmatpush1.bf16.msra.mxu0 %v4862_v62 }
 0x16b   :  { %2306 = vmatprep.subr.bf16.mxu0 %v4867_v63  ;;  %2346 = vmatpush1.bf16.msra.mxu1 %v4910_v20 }
 0x16c   :  { %2347 = vmatprep.subr.bf16.mxu1 %v4915_v6 }
 0x16e   :  { %2307 = vmatpush1.bf16.msra.mxu0 %v4865_v2 }
 0x16f   :  { %2308 = vmatprep.subr.bf16.mxu0 %v4870_v3  ;;  %2348 = vmatpush1.bf16.msra.mxu1 %v4913_v10  ;;  %v4951_v3 = vld [vmem:[#allocation8 + $0x184] ss:$8 sps:$4 sm:$0xff]  }
 0x170   :  { %2349 = vmatprep.subr.bf16.mxu1 %v4918_v39 }
 0x172   :  { %2309 = vmatpush1.bf16.msra.mxu0 %v4868_v47  ;;  %v5651_v47 = vshrl.u32 %v428_v4, 7 }
 0x173   :  { %2310 = vmatprep.subr.bf16.mxu0 %v4873_v5  ;;  %2350 = vmatpush1.bf16.msra.mxu1 %v4916_v13  ;;  %v426_v5 = vld [vmem:[%s5737_s3] sm:$0xf] }
 0x174   :  { %2351 = vmatprep.subr.bf16.mxu1 %v4921_v21  ;;  %v5654_v20 = vsub.s32 0, %v5651_v47  ;;  %v5660_v6 = vsub.s32 1, %v5651_v47 }
 0x176   :  { %2311 = vmatpush1.bf16.msra.mxu0 %v4871_v7  ;;  %v431_v7 = vrot.slane %v426_v5, %v5654_v20  ;;  %v435_v10 = vrot.slane %v426_v5, %v5660_v6 }
 0x177   :  { %2312 = vmatprep.subr.bf16.mxu0 %v4876_v11  ;;  %2352 = vmatpush1.bf16.msra.mxu1 %v4919_v22 }
 0x178   :  { %2353 = vmatprep.subr.bf16.mxu1 %v4924_v29 }
 0x17a   :  { %2313 = vmatpush1.bf16.msra.mxu0 %v4874_v12 }
 0x17b   :  { %2314 = vmatprep.subr.bf16.mxu0 %v4879_v14  ;;  %2354 = vmatpush1.bf16.msra.mxu1 %v4922_v30 }
 0x17c   :  { %2355 = vmatprep.subr.bf16.mxu1 %v4927_v52  ;;  %v4954_v52 = vld [vmem:[#allocation10 + $0x70] sm:$0xff]  }
 0x17e   :  { %2315 = vmatpush1.bf16.msra.mxu0 %v4877_v15 }
 0x17f   :  { %2316 = vmatprep.subr.bf16.mxu0 %v4882_v16  ;;  %2356 = vmatpush1.bf16.msra.mxu1 %v4925_v37  ;;  %v4953_v37 = vld [vmem:[#allocation10 + $0x38] sm:$0xff]  }
 0x180   :  { %2357 = vmatprep.subr.bf16.mxu1 %v4930_v38  ;;  %v438_v38 = vsub.s32 2, %v5651_v47 }
 0x181   :  { %v5642_v23 = vpop.f32.mrf.mxu0 }
 0x182   :  { %v5644_v24 = vpop.f32.mrf.mxu1  ;;  %2317 = vmatpush2.bf16.msra.mxu0 %v4880_v17  ;;  %v1603_v11 = vadd.f32 %v5642_v23, %v431_v7 }
 0x183   :  { %v5646_v26 = vpop.f32.mrf.mxu0  ;;  %2318 = vmatprep.subr.bf16.mxu0 %v4885_v19  ;;  %2358 = vmatpush2.bf16.msra.mxu1 %v4928_v40  ;;  %v4956_v40 = vld [vmem:[#allocation10 + $0x68] sm:$0xff]  }
 0x184   :  { %v5648_v27 = vpop.f32.mrf.mxu1  ;;  %2359 = vmatprep.subr.bf16.mxu1 %v4933_v42  ;;  %v1605_v39 = vadd.f32 %v5646_v26, %v435_v10  ;;  %v1644_v12 = vadd.f32 %v5644_v24, %v1603_v11  ;;  %v439_v42 = vrot.slane %v426_v5, %v438_v38 }
 0x185   :  { %v1606_v31 = vpop.f32.mrf.mxu0 }
 0x186   :  { %v1647_v32 = vpop.f32.mrf.mxu1  ;;  %2319 = vmatpush2.bf16.msra.mxu0 %v4883_v25  ;;  %v1646_v14 = vadd.f32 %v5648_v27, %v1605_v39  ;;  %v4964_v39 = vld [vmem:[#allocation10 + $0x48] sm:$0xff]  }
 0x187   :  { %v1607_v34 = vpop.f32.mrf.mxu0  ;;  %2320 = vmatprep.subr.bf16.mxu0 %v4888_v28  ;;  %2360 = vmatpush2.bf16.msra.mxu1 %v4931_v44  ;;  %v4958_v44 = vld [vmem:[#allocation10 + $0x60] sm:$0xff]  }
 0x188   :  { %v1648_v35 = vpop.f32.mrf.mxu1  ;;  %2361 = vmatprep.subr.bf16.mxu1 %v4936_v46 }
 0x18a   :  { %2321 = vmatpush2.bf16.msra.mxu0 %v4886_v33 }
 0x18b   :  { %2322 = vmatprep.subr.bf16.mxu0 %v4891_v36  ;;  %2362 = vmatpush2.bf16.msra.mxu1 %v4934_v50  ;;  %v4952_v36 = vld [vmem:[#allocation10 + $0x78] sm:$0xff]  }
 0x18c   :  { %2363 = vmatprep.subr.bf16.mxu1 %v4939_v53  ;;  %v4960_v50 = vld [vmem:[#allocation10 + $0x58] sm:$0xff]  }
 0x18e   :  { %2323 = vmatpush2.bf16.msra.mxu0 %v4889_v9  ;;  %v4955_v9 = vld [vmem:[#allocation10 + $0x30] sm:$0xff]  }
 0x18f   :  { %2324 = vmatprep.subr.bf16.mxu0 %v4894_v41  ;;  %2364 = vmatpush2.bf16.msra.mxu1 %v4937_v55  ;;  %v442_v41 = vsub.s32 3, %v5651_v47 }
 0x190   :  { %2365 = vmatprep.subr.bf16.mxu1 %v4942_v57 }
 0x192   :  { %2325 = vmatpush2.bf16.msra.mxu0 %v4892_v43  ;;  %v4957_v43 = vld [vmem:[#allocation10 + $0x28] sm:$0xff]  }
 0x193   :  { %2326 = vmatprep.subr.bf16.mxu0 %v4897_v45  ;;  %2366 = vmatpush2.bf16.msra.mxu1 %v4940_v59  ;;  %v443_v45 = vrot.slane %v426_v5, %v442_v41 }
 0x194   :  { %2367 = vmatprep.subr.bf16.mxu1 %v4945_v60 }
 0x196   :  { %2327 = vmatpush2.bf16.msra.mxu0 %v4895_v48  ;;  %v4959_v48 = vld [vmem:[#allocation10 + $0x20] sm:$0xff]  }
 0x197   :  { %2328 = vmatprep.subr.bf16.mxu0 %v4900_v51  ;;  %2368 = vmatpush2.bf16.msra.mxu1 %v4943_v61  ;;  %v4962_v61 = vld [vmem:[#allocation10 + $0x50] sm:$0xff]  }
 0x198   :  { %2369 = vmatprep.subr.bf16.mxu1 %v4948_v0 }
 0x19a   :  { %2329 = vmatpush2.bf16.msra.mxu0 %v4898_v54 }
 0x19b   :  { %2330 = vmatprep.subr.bf16.mxu0 %v4903_v56  ;;  %2370 = vmatpush2.bf16.msra.mxu1 %v4946_v1 }
 0x19c   :  { %2371 = vmatprep.subr.bf16.mxu1 %v4951_v3 }
 0x19e   :  { %2331 = vmatpush2.bf16.msra.mxu0 %v4901_v58  ;;  %v4961_v58 = vld [vmem:[#allocation10 + $0x18] sm:$0xff]  }
 0x19f   :  { %2372 = vmatpush2.bf16.msra.mxu1 %v4949_v8  ;;  %4395 = vmatprep.subr.bf16.mxu0 %v4952_v36 }
 0x1a2   :  { %v1725_v62 = vpop.f32.mrf.mxu1 }
 0x1a4   :  { %v1727_v63 = vpop.f32.mrf.mxu1 }
 0x1a6   :  { %v1729_v49 = vpop.f32.mrf.mxu1 }
 0x1a8   :  { %v1730_v2 = vpop.f32.mrf.mxu1 }
 0x1a9   :  { %v4963_v2 = vld [vmem:[#allocation10 + $0x10] sm:$0xff]  }
 0x1c1   :  { %v1684_v13 = vpop.f32.mrf.mxu0 }
 0x1c2   :  { %v1685_v15 = vadd.f32 %v1684_v13, %v1644_v12  ;;  %v4965_v12 = vld [vmem:[#allocation10 + $0x8] sm:$0xff]   ;;  %v4966_v13 = vld [vmem:[#allocation10 + $0x40] sm:$0xff]  }
 0x1c3   :  { %v1686_v16 = vpop.f32.mrf.mxu0 }
 0x1c4   :  { %v1726_v17 = vadd.f32 %v1725_v62, %v1685_v15  ;;  %v1687_v19 = vadd.f32 %v1686_v16, %v1646_v14  ;;  %v4967_v14 = vld [vmem:[#allocation10] sm:$0xff]   ;;  %v4968_v15 = vld [vmem:[#allocation11 + $0x38] sm:$0xff]   ;;  %v5473_v16 = vmov 0.0  }
 0x1c5   :  { %v1688_v21 = vpop.f32.mrf.mxu0  ;;  %4457 = vmatprep.subr.bf16.mxu1 %v5473_v16 }
 0x1c6   :  { %v1728_v22 = vadd.f32 %v1727_v63, %v1687_v19  ;;  %v1896_v25 = vmax.f32 %v1726_v17, 0.0  ;;  %v4969_v17 = vld [vmem:[#allocation11 + $0x30] sm:$0xff]   ;;  %v4970_v19 = vld [vmem:[#allocation11 + $0x28] sm:$0xff]   ;;  %v4971_v21 = vld [vmem:[#allocation11 + $0x20] sm:$0xff]  }
 0x1c7   :  { %v1689_v28 = vpop.f32.mrf.mxu0 }
 0x1c8   :  { %v1897_v29 = vmax.f32 %v1728_v22, 0.0  ;;  %v1900_v31 = vpack.c.bf16 %v1896_v25, %v1896_v25  ;;  %v4972_v22 = vld [vmem:[#allocation11 + $0x18] sm:$0xff]  }
 0x1ca   :  { %v1901_v30 = vpack.c.bf16 %v1897_v29, %v1897_v29 }
 0x1cc   :  { %2332 = vmatprep.mubr.bf16.mxu0 %v1901_v30 }
 0x1cd   :  { %2333 = vmatmul.mubr.bf16.vlgmr.msra.gmra.mxu0 %v1900_v31  ;;  %v1968_v31 = vld [vmem:[%s5739_s5] sm:$0x3] }
 0x1ce   :  { %4396 = vmatpush3.bf16.msra.mxu0 %v4953_v37 }
 0x1cf   :  { %4397 = vmatprep.subr.bf16.mxu0 %v4954_v52 }
 0x1d2   :  { %4398 = vmatpush3.bf16.msra.mxu0 %v4955_v9 }
 0x1d3   :  { %4399 = vmatprep.subr.bf16.mxu0 %v4956_v40 }
 0x1d6   :  { %4400 = vmatpush3.bf16.msra.mxu0 %v4957_v43  ;;  %v4973_v43 = vld [vmem:[#allocation11 + $0x10] sm:$0xff]  }
 0x1d7   :  { %4401 = vmatprep.subr.bf16.mxu0 %v4958_v44  ;;  %v4974_v44 = vld [vmem:[#allocation11 + $0x8] sm:$0xff]  }
 0x1da   :  { %4402 = vmatpush3.bf16.msra.mxu0 %v4959_v48  ;;  %v4977_v48 = vld [vmem:[#allocation14 + $0x30] sm:$0xff]  }
 0x1db   :  { %4403 = vmatprep.subr.bf16.mxu0 %v4960_v50 }
 0x1de   :  { %4404 = vmatpush3.bf16.msra.mxu0 %v4961_v58 }
 0x1df   :  { %4405 = vmatprep.subr.bf16.mxu0 %v4962_v61  ;;  %v4979_v61 = vld [vmem:[#allocation14 + $0x20] sm:$0xff]  }
 0x1e2   :  { %v1766_v23 = vpop.f32.mrf.mxu1  ;;  %4406 = vmatpush3.bf16.msra.mxu0 %v4963_v2  ;;  %v4989_v2 = vld [vmem:[#allocation16 + $0x64] ss:$8 sps:$4 sm:$0xff]  }
 0x1e3   :  { %v1767_v46 = vadd.f32 %v1766_v23, %v439_v42  ;;  %4407 = vmatprep.subr.bf16.mxu0 %v4964_v39  ;;  %v1973_v23 = vrot.slane %v1968_v31, %v5654_v20  ;;  %v4996_v39 = vld [vmem:[#allocation16 + $0x30] ss:$8 sps:$4 sm:$0xff]  }
 0x1e4   :  { %v1768_v26 = vpop.f32.mrf.mxu1 }
 0x1e5   :  { %v1769_v51 = vadd.f32 %v1768_v26, %v443_v45  ;;  %v1977_v26 = vrot.slane %v1968_v31, %v5660_v6  ;;  %v4975_v45 = vld [vmem:[#allocation11] sm:$0xff]  }
 0x1e6   :  { %v1770_v32 = vpop.f32.mrf.mxu1  ;;  %4408 = vmatpush3.bf16.msra.mxu0 %v4965_v12  ;;  %v5001_v12 = vld [vmem:[#allocation16 + $0x24] ss:$8 sps:$4 sm:$0xff]  }
 0x1e7   :  { %4409 = vmatprep.subr.bf16.mxu0 %v4966_v13  ;;  %v4999_v13 = vld [vmem:[#allocation16 + $0x20] ss:$8 sps:$4 sm:$0xff]  }
 0x1e8   :  { %v1771_v24 = vpop.f32.mrf.mxu1 }
 0x1ea   :  { %4410 = vmatpush3.bf16.msra.mxu0 %v4967_v14  ;;  %v5004_v14 = vld [vmem:[#allocation16 + $0x14] ss:$8 sps:$4 sm:$0xff]  }
 0x1eb   :  { %4477 = vmatprep.subr.bf16.mxu0 %v5473_v16 }
 0x201   :  { %v1807_v33 = vpop.f32.mrf.mxu0 }
 0x202   :  { %v1808_v53 = vadd.f32 %v1807_v33, %v1767_v46  ;;  %v4976_v46 = vld [vmem:[#allocation14 + $0x38] sm:$0xff]  }
 0x203   :  { %v1809_v34 = vpop.f32.mrf.mxu0 }
 0x204   :  { %v1810_v56 = vadd.f32 %v1809_v34, %v1769_v51  ;;  %v4225_v51 = vld [vmem:[%s5741_s7] ss:$0 sm:$0xff] }
 0x205   :  { %v1811_v27 = vpop.f32.mrf.mxu0 }
 0x207   :  { %v1812_v35 = vpop.f32.mrf.mxu0 }
 0x221   :  { %v1889_v55 = vpop.f32.mrf.mxu0 }
 0x222   :  { %v1848_v54 = vpop.f32.mrf.mxu1 }
 0x223   :  { %v1849_v57 = vadd.f32 %v1848_v54, %v1808_v53  ;;  %v1891_v60 = vpop.f32.mrf.mxu0 }
 0x224   :  { %v1850_v59 = vpop.f32.mrf.mxu1 }
 0x225   :  { %v1890_v62 = vadd.f32 %v1889_v55, %v1849_v57  ;;  %v1851_v63 = vadd.f32 %v1850_v59, %v1810_v56  ;;  %v1893_v1 = vpop.f32.mrf.mxu0 }
 0x226   :  { %v1852_v0 = vpop.f32.mrf.mxu1  ;;  %v4984_v1 = vld [vmem:[#allocation16 + $0x70] ss:$8 sps:$4 sm:$0xff]  }
 0x227   :  { %v1892_v49 = vadd.f32 %v1891_v60, %v1851_v63  ;;  %v1898_v3 = vmax.f32 %v1890_v62, 0.0  ;;  %v1894_v5 = vpop.f32.mrf.mxu0  ;;  %v4978_v60 = vld [vmem:[#allocation14 + $0x28] sm:$0xff]   ;;  %v4980_v62 = vld [vmem:[#allocation14 + $0x18] sm:$0xff]   ;;  %v4981_v63 = vld [vmem:[#allocation14 + $0x10] sm:$0xff]  }
 0x228   :  { %v1853_v8 = vpop.f32.mrf.mxu1  ;;  %v4982_v0 = vld [vmem:[#allocation14 + $0x8] sm:$0xff]   ;;  %v4990_v5 = vld [vmem:[#allocation16 + $0x50] ss:$8 sps:$4 sm:$0xff]  }
 0x229   :  { %v1899_v7 = vmax.f32 %v1892_v49, 0.0  ;;  %v1902_v11 = vpack.c.bf16 %v1898_v3, %v1898_v3  ;;  %v4986_v49 = vld [vmem:[#allocation16 + $0x74] ss:$8 sps:$4 sm:$0xff]   ;;  %v4987_v3 = vld [vmem:[#allocation16 + $0x60] ss:$8 sps:$4 sm:$0xff]  }
 0x22a   :  { %v4992_v8 = vld [vmem:[#allocation16 + $0x54] ss:$8 sps:$4 sm:$0xff]  }
 0x22b   :  { %v1903_v10 = vpack.c.bf16 %v1899_v7, %v1899_v7  ;;  %v4995_v7 = vld [vmem:[#allocation16 + $0x44] ss:$8 sps:$4 sm:$0xff]  }
 0x22d   :  { %2373 = vmatprep.mubr.bf16.mxu1 %v1903_v10  ;;  %v4993_v10 = vld [vmem:[#allocation16 + $0x40] ss:$8 sps:$4 sm:$0xff]  }
 0x22e   :  { %2374 = vmatmul.mubr.bf16.vlgmr.msra.gmra.mxu1 %v1902_v11  ;;  %v4998_v11 = vld [vmem:[#allocation16 + $0x34] ss:$8 sps:$4 sm:$0xff]  }
 0x22f   :  { %4458 = vmatpush3.bf16.msra.mxu1 %v4968_v15  ;;  %4473 = vmatprep.mubr.msk.bf16.mxu1 %vm5474_vm0, %v5473_v16  ;;  %v5002_v15 = vld [vmem:[#allocation16 + $0x10] ss:$8 sps:$4 sm:$0xff]  }
 0x230   :  { %4459 = vmatprep.subr.bf16.mxu1 %v5473_v16 }
 0x233   :  { %4460 = vmatpush3.bf16.msra.mxu1 %v4969_v17 }
 0x234   :  { %4461 = vmatprep.subr.bf16.mxu1 %v5473_v16 }
 0x237   :  { %4462 = vmatpush3.bf16.msra.mxu1 %v4970_v19 }
 0x238   :  { %4463 = vmatprep.subr.bf16.mxu1 %v5473_v16 }
 0x23b   :  { %4464 = vmatpush3.bf16.msra.mxu1 %v4971_v21 }
 0x23c   :  { %4465 = vmatprep.subr.bf16.mxu1 %v5473_v16 }
 0x23f   :  { %4466 = vmatpush3.bf16.msra.mxu1 %v4972_v22 }
 0x240   :  { %4467 = vmatprep.subr.bf16.mxu1 %v5473_v16 }
 0x243   :  { %4468 = vmatpush3.bf16.msra.mxu1 %v4973_v43  ;;  %v5032_v43 = vld [vmem:[#allocation17 + $0xa8] ss:$28 sps:$4 sm:$0xff]  }
 0x244   :  { %4469 = vmatprep.subr.bf16.mxu1 %v5473_v16 }
 0x247   :  { %4470 = vmatpush3.bf16.msra.mxu1 %v4974_v44  ;;  %v5040_v44 = vld [vmem:[#allocation17 + $0x74] ss:$28 sps:$4 sm:$0xff]  }
 0x248   :  { %4471 = vmatprep.subr.bf16.mxu1 %v5473_v16 }
 0x24b   :  { %4472 = vmatpush3.bf16.msra.mxu1 %v4975_v45  ;;  %v5038_v45 = vld [vmem:[#allocation17 + $0x70] ss:$28 sps:$4 sm:$0xff]  }
 0x24c   :  { %2905 = vmatprep.subr.bf16.mxu1 %v4986_v49 }
 0x28d   :  { %v2334_v25 = vpop.f32.mrf.mxu0 }
 0x28e   :  { %v2335_v32 = vadd.f32 %v2334_v25, %v1973_v23 }
 0x28f   :  { %v2336_v28 = vpop.f32.mrf.mxu0 }
 0x290   :  { %v2337_v33 = vadd.f32 %v2336_v28, %v1977_v26 }
 0x291   :  { %v2338_v29 = vpop.f32.mrf.mxu0 }
 0x292   :  { %v2676_v29 = vand.u32 127, %v428_v4  ;;  %v5022_v4 = vld [vmem:[#allocation17 + $0x11c] ss:$28 sps:$4 sm:$0xff]  }
 0x293   :  { %v2339_v30 = vpop.f32.mrf.mxu0 }
 0x294   :  { %v2678_v30 = vld [vmem:[#allocation5] sm:$0xff]  ;;  %vm2677_vm1 = vcmp.lt.s32.totalorder %v2676_v29, 64  ;;  %v5053_v29 = vld [vmem:[#allocation17 + $0x8] ss:$28 sps:$4 sm:$0xff]  }
 0x2ee   :  { %v2375_v24 = vpop.f32.mrf.mxu1 }
 0x2ef   :  { %v2376_v34 = vadd.f32 %v2375_v24, %v2335_v32  ;;  %v5007_v24 = vld [vmem:[#allocation16 + $0x4] ss:$8 sps:$4 sm:$0xff]  }
 0x2f0   :  { %v2377_v27 = vpop.f32.mrf.mxu1 }
 0x2f1   :  { %v2378_v35 = vadd.f32 %v2377_v27, %v2337_v33  ;;  %v2382_v36 = vmax.f32 %v2376_v34, 0.0  ;;  %v5005_v33 = vld [vmem:[#allocation16] ss:$8 sps:$4 sm:$0xff]  }
 0x2f2   :  { %v2379_v37 = vpop.f32.mrf.mxu1  ;;  %v5008_v34 = vld [vmem:[#allocation17 + $0x188] ss:$28 sps:$4 sm:$0xff]  }
 0x2f3   :  { %v2383_v52 = vmax.f32 %v2378_v35, 0.0  ;;  %v2384_v42 = vpack.c.bf16 %v2382_v36, %v2382_v36  ;;  %v5010_v27 = vld [vmem:[#allocation17 + $0x18c] ss:$28 sps:$4 sm:$0xff]   ;;  %v5013_v35 = vld [vmem:[#allocation17 + $0x194] ss:$28 sps:$4 sm:$0xff]  }
 0x2f4   :  { %v2380_v9 = vpop.f32.mrf.mxu1  ;;  %v5016_v36 = vld [vmem:[#allocation17 + $0x154] ss:$28 sps:$4 sm:$0xff]  }
 0x2f5   :  { %v2385_v40 = vpack.c.bf16 %v2383_v52, %v2383_v52  ;;  %v5014_v37 = vld [vmem:[#allocation17 + $0x150] ss:$28 sps:$4 sm:$0xff]   ;;  %v5020_v52 = vld [vmem:[#allocation17 + $0x118] ss:$28 sps:$4 sm:$0xff]   ;;  %v5028_v9 = vld [vmem:[#allocation17 + $0xe4] ss:$28 sps:$4 sm:$0xff]  }
 0x2f7   :  { %2553 = vmatprep.mubr.bf16.mxu0 %v2385_v40  ;;  %v5026_v40 = vld [vmem:[#allocation17 + $0xe0] ss:$28 sps:$4 sm:$0xff]  }
 0x2f8   :  { %2554 = vmatmul.mubr.bf16.vlgmr.msra.gmra.mxu0 %v2384_v42  ;;  %v5034_v42 = vld [vmem:[#allocation17 + $0xac] ss:$28 sps:$4 sm:$0xff]  }
 0x2f9   :  { %4493 = vmatprep.mubr.msk.bf16.mxu0 %vm5474_vm0, %v5473_v16  ;;  %4478 = vmatpush3.bf16.msra.mxu0 %v4976_v46  ;;  %v5046_v46 = vld [vmem:[#allocation17 + $0x3c] ss:$28 sps:$4 sm:$0xff]  }
 0x2fa   :  { %4479 = vmatprep.subr.bf16.mxu0 %v5473_v16 }
 0x2fd   :  { %4480 = vmatpush3.bf16.msra.mxu0 %v4977_v48  ;;  %v5044_v48 = vld [vmem:[#allocation17 + $0x38] ss:$28 sps:$4 sm:$0xff]  }
 0x2fe   :  { %4481 = vmatprep.subr.bf16.mxu0 %v5473_v16 }
 0x301   :  { %4482 = vmatpush3.bf16.msra.mxu0 %v4978_v60  ;;  %v5074_v60 = vld [vmem:[#allocation17 + $0x2a0] ss:$28 sps:$4 sm:$0xff]  }
 0x302   :  { %4483 = vmatprep.subr.bf16.mxu0 %v5473_v16 }
 0x305   :  { %4484 = vmatpush3.bf16.msra.mxu0 %v4979_v61  ;;  %v5082_v61 = vld [vmem:[#allocation17 + $0x26c] ss:$28 sps:$4 sm:$0xff]  }
 0x306   :  { %4485 = vmatprep.subr.bf16.mxu0 %v5473_v16 }
 0x309   :  { %4486 = vmatpush3.bf16.msra.mxu0 %v4980_v62  ;;  %v5080_v62 = vld [vmem:[#allocation17 + $0x268] ss:$28 sps:$4 sm:$0xff]  }
 0x30a   :  { %4487 = vmatprep.subr.bf16.mxu0 %v5473_v16 }
 0x30d   :  { %4488 = vmatpush3.bf16.msra.mxu0 %v4981_v63  ;;  %v5088_v63 = vld [vmem:[#allocation17 + $0x234] ss:$28 sps:$4 sm:$0xff]  }
 0x30e   :  { %4489 = vmatprep.subr.bf16.mxu0 %v5473_v16 }
 0x311   :  { %4490 = vmatpush3.bf16.msra.mxu0 %v4982_v0  ;;  %v5086_v0 = vld [vmem:[#allocation17 + $0x230] ss:$28 sps:$4 sm:$0xff]  }
 0x312   :  { %4491 = vmatprep.subr.bf16.mxu0 %v5473_v16  ;;  %v4242_v16 = vld [vmem:[#allocation13] ss:$0 sm:$0xff] }
 0x3b8   :  { %v4411_v50 = vpop.f32.mrf.mxu0 }
 0x3ba   :  { %v4412_v53 = vpop.f32.mrf.mxu0 }
 0x3bb   :  { %v4413_v54 = vadd.f32 %v4412_v53, %v4411_v50  ;;  %v5052_v50 = vld [vmem:[#allocation17 + $0x4] ss:$28 sps:$4 sm:$0xff]   ;;  %v5058_v53 = vld [vmem:[#allocation17 + $0x34c] ss:$28 sps:$4 sm:$0xff]  }
 0x3bc   :  { %v4414_v55 = vpop.f32.mrf.mxu0 }
 0x3bd   :  { %v2556_v56 = vadd.f32 %v4413_v54, %v4225_v51  ;;  %v5050_v51 = vld [vmem:[#allocation17] ss:$28 sps:$4 sm:$0xff]   ;;  %v5056_v54 = vld [vmem:[#allocation17 + $0x348] ss:$28 sps:$4 sm:$0xff]   ;;  %v5064_v55 = vld [vmem:[#allocation17 + $0x314] ss:$28 sps:$4 sm:$0xff]  }
 0x3be   :  { %v4415_v57 = vpop.f32.mrf.mxu0 }
 0x3bf   :  { %v2561_v58 = vmax.f32 %v2556_v56, 0.0  ;;  %v5062_v56 = vld [vmem:[#allocation17 + $0x310] ss:$28 sps:$4 sm:$0xff]   ;;  %v5070_v57 = vld [vmem:[#allocation17 + $0x2dc] ss:$28 sps:$4 sm:$0xff]  }
 0x3c1   :  { %v2562_v59 = vpack.c.bf16 %v2561_v58, %v2561_v58  ;;  %v5068_v58 = vld [vmem:[#allocation17 + $0x2d8] ss:$28 sps:$4 sm:$0xff]  }
 0x3c3   :  { %4474 = vmatmul.mubr.bf16.vlgmr.msra.gmra.mxu1 %v2562_v59  ;;  %v5076_v59 = vld [vmem:[#allocation17 + $0x2a4] ss:$28 sps:$4 sm:$0xff]  }
 0x3c4   :  { %2937 = vmatprep.mubr.bf16.mxu1 %v5472_v18  ;;  %v4983_v18 = vld [vmem:[#allocation14] sm:$0xff]   ;;  %2906 = vmatpush1.bf16.msra.mxu1 %v4984_v1 }
 0x3c5   :  { %4492 = vmatpush3.bf16.msra.mxu0 %v4983_v18  ;;  %2907 = vmatprep.subr.bf16.mxu1 %v4989_v2  ;;  %v4251_v18 = vld [vmem:[%s5745_s11] ss:$0 sm:$0xff] }
 0x3c6   :  { %3691 = vmatprep.subr.bf16.mxu0 %v5010_v27  ;;  %v5085_v27 = vld [vmem:[#allocation17 + $0x274] ss:$28 sps:$4 sm:$0xff]  }
 0x3c8   :  { %2908 = vmatpush1.bf16.msra.mxu1 %v4987_v3 }
 0x3c9   :  { %2909 = vmatprep.subr.bf16.mxu1 %v4992_v8 }
 0x3cc   :  { %2910 = vmatpush1.bf16.msra.mxu1 %v4990_v5  ;;  %v5011_v5 = vld [vmem:[#allocation17 + $0x190] ss:$28 sps:$4 sm:$0xff]  }
 0x3cd   :  { %2911 = vmatprep.subr.bf16.mxu1 %v4995_v7 }
 0x3d0   :  { %2912 = vmatpush1.bf16.msra.mxu1 %v4993_v10  ;;  %v5019_v10 = vld [vmem:[#allocation17 + $0x15c] ss:$28 sps:$4 sm:$0xff]  }
 0x3d1   :  { %2913 = vmatprep.subr.bf16.mxu1 %v4998_v11 }
 0x3d4   :  { %2914 = vmatpush1.bf16.msra.mxu1 %v4996_v39  ;;  %v5017_v39 = vld [vmem:[#allocation17 + $0x158] ss:$28 sps:$4 sm:$0xff]  }
 0x3d5   :  { %2915 = vmatprep.subr.bf16.mxu1 %v5001_v12  ;;  %v5025_v12 = vld [vmem:[#allocation17 + $0x124] ss:$28 sps:$4 sm:$0xff]  }
 0x3d8   :  { %2916 = vmatpush1.bf16.msra.mxu1 %v4999_v13  ;;  %v5023_v13 = vld [vmem:[#allocation17 + $0x120] ss:$28 sps:$4 sm:$0xff]  }
 0x3d9   :  { %2917 = vmatprep.subr.bf16.mxu1 %v5004_v14  ;;  %v5031_v14 = vld [vmem:[#allocation17 + $0xec] ss:$28 sps:$4 sm:$0xff]  }
 0x3dc   :  { %2918 = vmatpush1.bf16.msra.mxu1 %v5002_v15  ;;  %v5029_v15 = vld [vmem:[#allocation17 + $0xe8] ss:$28 sps:$4 sm:$0xff]  }
 0x3dd   :  { %2919 = vmatprep.subr.bf16.mxu1 %v5007_v24  ;;  %v5071_v24 = vld [vmem:[#allocation17 + $0x2e0] ss:$28 sps:$4 sm:$0xff]  }
 0x3e0   :  { %2920 = vmatpush1.bf16.msra.mxu1 %v5005_v33  ;;  %v5079_v33 = vld [vmem:[#allocation17 + $0x2ac] ss:$28 sps:$4 sm:$0xff]  }
 0x3e1   :  { %3732 = vmatprep.subr.bf16.mxu1 %v5013_v35  ;;  %v5083_v35 = vld [vmem:[#allocation17 + $0x270] ss:$28 sps:$4 sm:$0xff]  }
 0x483   :  { %v2668_v17 = vpop.f32.mrf.mxu1 }
 0x484   :  { %v2669_v19 = vadd.f32 %v4242_v16, %v2668_v17  ;;  %v5037_v16 = vld [vmem:[#allocation17 + $0xb4] ss:$28 sps:$4 sm:$0xff]  }
 0x485   :  { %v4475_v21 = vpop.f32.mrf.mxu1  ;;  %v5035_v17 = vld [vmem:[#allocation17 + $0xb0] ss:$28 sps:$4 sm:$0xff]  }
 0x486   :  { %v2679_v22 = vmul.f32 1.442695, %v2669_v19  ;;  %2674 = vst [vmem:[#allocation20] sm:$0xff] %v2669_v19  ;;  %v5041_v21 = vld [vmem:[#allocation17 + $0x78] ss:$28 sps:$4 sm:$0xff]  }
 0x487   :  { %v2671_v25 = vpop.f32.mrf.mxu1 }
 0x488   :  { %5168 = vpow2.f32 %v2679_v22  ;;  %v5049_v22 = vld [vmem:[#allocation17 + $0x44] ss:$28 sps:$4 sm:$0xff]  }
 0x489   :  { %v4476_v28 = vpop.f32.mrf.mxu1  ;;  %v5047_v25 = vld [vmem:[#allocation17 + $0x40] ss:$28 sps:$4 sm:$0xff]  }
 0x48a   :  { %v5055_v28 = vld [vmem:[#allocation17 + $0xc] ss:$28 sps:$4 sm:$0xff]  }
 0x495   :  { %v5169_v31 = vpop.eup %5168 }
 0x496   :  { %v2681_v23 = vmul.f32 %v5169_v31, %v2678_v30  ;;  %v5061_v30 = vld [vmem:[#allocation17 + $0x354] ss:$28 sps:$4 sm:$0xff]  }
 0x497   :  { %v5059_v31 = vld [vmem:[#allocation17 + $0x350] ss:$28 sps:$4 sm:$0xff]  }
 0x498   :  { %v2682_v26 = vsel %vm2677_vm1, %v2669_v19, %v2681_v23  ;;  %v5043_v19 = vld [vmem:[#allocation17 + $0x7c] ss:$28 sps:$4 sm:$0xff]  }
 0x499   :  { %v2683_v32 = vpack.c.bf16 %v2682_v26, %v2682_v26  ;;  %v5067_v23 = vld [vmem:[#allocation17 + $0x31c] ss:$28 sps:$4 sm:$0xff]  }
 0x49a   :  { %v5065_v26 = vld [vmem:[#allocation17 + $0x318] ss:$28 sps:$4 sm:$0xff]  }
 0x49b   :  { %4494 = vmatmul.mubr.bf16.vlgmr.msra.gmra.mxu0 %v2683_v32  ;;  %v5073_v32 = vld [vmem:[#allocation17 + $0x2e4] ss:$28 sps:$4 sm:$0xff]  }
 0x49c   :  { %3692 = vmatpush1.bf16.msra.mxu0 %v5008_v34  ;;  %v5077_v34 = vld [vmem:[#allocation17 + $0x2a8] ss:$28 sps:$4 sm:$0xff]  }
 0x49d   :  { %3693 = vmatprep.subr.bf16.mxu0 %v5016_v36  ;;  %v5091_v36 = vld [vmem:[#allocation17 + $0x23c] ss:$28 sps:$4 sm:$0xff]  }
 0x4a0   :  { %3694 = vmatpush1.bf16.msra.mxu0 %v5014_v37  ;;  %v5089_v37 = vld [vmem:[#allocation17 + $0x238] ss:$28 sps:$4 sm:$0xff]  }
 0x4a1   :  { %3695 = vmatprep.subr.bf16.mxu0 %v5022_v4  ;;  %v5094_v4 = vld [vmem:[#allocation17 + $0x1fc] ss:$28 sps:$4 sm:$0xff]  }
 0x4a4   :  { %3696 = vmatpush1.bf16.msra.mxu0 %v5020_v52  ;;  %v5097_v52 = vld [vmem:[#allocation17 + $0x204] ss:$28 sps:$4 sm:$0xff]  }
 0x4a5   :  { %3697 = vmatprep.subr.bf16.mxu0 %v5028_v9  ;;  %v5092_v9 = vld [vmem:[#allocation17 + $0x1f8] ss:$28 sps:$4 sm:$0xff]  }
 0x4a8   :  { %3698 = vmatpush1.bf16.msra.mxu0 %v5026_v40  ;;  %v5095_v40 = vld [vmem:[#allocation17 + $0x200] ss:$28 sps:$4 sm:$0xff]  }
 0x4a9   :  { %3699 = vmatprep.subr.bf16.mxu0 %v5034_v42  ;;  %v5100_v42 = vld [vmem:[#allocation17 + $0x1c4] ss:$28 sps:$4 sm:$0xff]  }
 0x4ac   :  { %3700 = vmatpush1.bf16.msra.mxu0 %v5032_v43  ;;  %v5103_v43 = vld [vmem:[#allocation17 + $0x1cc] ss:$28 sps:$4 sm:$0xff]  }
 0x4ad   :  { %3701 = vmatprep.subr.bf16.mxu0 %v5040_v44  ;;  %v5098_v44 = vld [vmem:[#allocation17 + $0x1c0] ss:$28 sps:$4 sm:$0xff]  }
 0x4b0   :  { %3702 = vmatpush1.bf16.msra.mxu0 %v5038_v45  ;;  %v5101_v45 = vld [vmem:[#allocation17 + $0x1c8] ss:$28 sps:$4 sm:$0xff]  }
 0x4b1   :  { %3703 = vmatprep.subr.bf16.mxu0 %v5046_v46  ;;  %v5106_v46 = vld [vmem:[#allocation17 + $0x19c] ss:$28 sps:$4 sm:$0xff]  }
 0x4b4   :  { %3704 = vmatpush1.bf16.msra.mxu0 %v5044_v48  ;;  %v5107_v48 = vld [vmem:[#allocation17 + $0x360] ss:$28 sps:$4 sm:$0xff]  }
 0x4b5   :  { %3705 = vmatprep.subr.bf16.mxu0 %v5052_v50  ;;  %v2813_v50 = vld [vmem:[%s5747_s13] sm:$0x3]  ;;  %s5475_s13 = smov [#allocation20]  }
 0x4b6   :  { %s3919_s26 = sshll.u32 %s5475_s13, 4  ;;  %s3920_s26 = int_to_ptr.vmem [resolvable:$true] %s3919_s26 }
 0x4b7   :  { %s5398_s2 = scalar_lea.vmem %s3920_s26, 128  ;;  %p5403_p9 = scmp.lt.s32.totalorder %s3920_s26, %s3920_s26 }
 0x4b8   :  { %3706 = vmatpush1.bf16.msra.mxu0 %v5050_v51  ;;  %v2818_v51 = vrot.slane %v2813_v50, %v5654_v20  ;;  %p5399_p8 = scmp.ne.s32.totalorder %s3920_s26, %s5398_s2  ;;  %p5404_p10 = scmp.lt.s32.totalorder %s5398_s2, %s5398_s2 }
 0x4b9   :  { %3707 = vmatprep.subr.bf16.mxu0 %v5058_v53  ;;  %v2822_v53 = vrot.slane %v2813_v50, %v5660_v6 }
 0x4ba   :  { %p5405_p11 = por %p5404_p10, %p5403_p9 }
 0x4bc   :  { %3708 = vmatpush2.bf16.msra.mxu0 %v5056_v54  ;;  %p5406_p12 = pnand %p5405_p11, %p5399_p8 }
 0x4bd   :  { %3709 = vmatprep.subr.bf16.mxu0 %v5064_v55 }
 0x4c0   :  { %3710 = vmatpush2.bf16.msra.mxu0 %v5062_v56 }
 0x4c1   :  { %3711 = vmatprep.subr.bf16.mxu0 %v5070_v57 }
 0x4c4   :  { %3712 = vmatpush2.bf16.msra.mxu0 %v5068_v58 }
 0x4c5   :  { %3713 = vmatprep.subr.bf16.mxu0 %v5076_v59 }
 0x4c8   :  { %3714 = vmatpush2.bf16.msra.mxu0 %v5074_v60 }
 0x4c9   :  { %3715 = vmatprep.subr.bf16.mxu0 %v5082_v61 }
 0x4cc   :  { %3716 = vmatpush2.bf16.msra.mxu0 %v5080_v62 }
 0x4cd   :  { %3717 = vmatprep.subr.bf16.mxu0 %v5088_v63  ;;  %v5104_v63 = vld [vmem:[#allocation17 + $0x198] ss:$28 sps:$4 sm:$0xff]  }
 0x4d0   :  { %3718 = vmatpush2.bf16.msra.mxu0 %v5086_v0  ;;  %v5108_v0 = vld [vmem:[#allocation17 + $0x1a0] ss:$28 sps:$4 sm:$0xff]  }
 0x4d1   :  { %3719 = vmatprep.subr.bf16.mxu0 %v5094_v4  ;;  %v5155_v4 = vld [vmem:[#allocation17 + $0x2b4] ss:$28 sps:$4 sm:$0xff]  }
 0x4d4   :  { %3720 = vmatpush2.bf16.msra.mxu0 %v5092_v9  ;;  %v5158_v9 = vld [vmem:[#allocation17 + $0x27c] ss:$28 sps:$4 sm:$0xff]  }
 0x4d5   :  { %3721 = vmatprep.subr.bf16.mxu0 %v5100_v42  ;;  %v5161_v42 = vld [vmem:[#allocation17 + $0x244] ss:$28 sps:$4 sm:$0xff]  }
 0x4d8   :  { %3722 = vmatpush2.bf16.msra.mxu0 %v5098_v44  ;;  %v5164_v44 = vld [vmem:[#allocation17 + $0x20c] ss:$28 sps:$4 sm:$0xff]  }
 0x4d9   :  { %3773 = vmatprep.subr.bf16.mxu0 %v5106_v46  ;;  %v5167_v46 = vld [vmem:[#allocation17 + $0x1d4] ss:$28 sps:$4 sm:$0xff]  }
 0x55b   :  { %v2789_v1 = vpop.f32.mrf.mxu0 }
 0x55c   :  { %v2790_v49 = vadd.f32 %v4251_v18, %v2789_v1  ;;  %v5111_v1 = vld [vmem:[#allocation17 + $0x164] ss:$28 sps:$4 sm:$0xff]  }
 0x55d   :  { %v4495_v2 = vpop.f32.mrf.mxu0 }
 0x55e   :  { %v2795_v3 = vmax.f32 %v2790_v49, 0.0  ;;  %v5112_v49 = vld [vmem:[#allocation17 + $0x328] ss:$28 sps:$4 sm:$0xff]   ;;  %v5109_v2 = vld [vmem:[#allocation17 + $0x160] ss:$28 sps:$4 sm:$0xff]  }
 0x55f   :  { %v2792_v8 = vpop.f32.mrf.mxu0 }
 0x560   :  { %v2796_v7 = vpack.c.bf16 %v2795_v3, %v2795_v3  ;;  %v5113_v3 = vld [vmem:[#allocation17 + $0x168] ss:$28 sps:$4 sm:$0xff]  }
 0x561   :  { %v4496_v11 = vpop.f32.mrf.mxu0  ;;  %v5116_v8 = vld [vmem:[#allocation17 + $0x12c] ss:$28 sps:$4 sm:$0xff]  }
 0x562   :  { %2938 = vmatmul.mubr.bf16.vlgmr.msra.gmra.mxu1 %v2796_v7  ;;  %v5114_v7 = vld [vmem:[#allocation17 + $0x128] ss:$28 sps:$4 sm:$0xff]   ;;  %v5121_v11 = vld [vmem:[#allocation17 + $0xf4] ss:$28 sps:$4 sm:$0xff]  }
 0x563   :  { %3733 = vmatpush1.bf16.msra.mxu1 %v5011_v5  ;;  %v5117_v5 = vld [vmem:[#allocation17 + $0x2f0] ss:$28 sps:$4 sm:$0xff]  }
 0x564   :  { %3734 = vmatprep.subr.bf16.mxu1 %v5019_v10  ;;  %v5118_v10 = vld [vmem:[#allocation17 + $0x130] ss:$28 sps:$4 sm:$0xff]  }
 0x567   :  { %3735 = vmatpush1.bf16.msra.mxu1 %v5017_v39  ;;  %v5122_v39 = vld [vmem:[#allocation17 + $0x2b8] ss:$28 sps:$4 sm:$0xff]  }
 0x568   :  { %3736 = vmatprep.subr.bf16.mxu1 %v5025_v12  ;;  %v5119_v12 = vld [vmem:[#allocation17 + $0xf0] ss:$28 sps:$4 sm:$0xff]  }
 0x56b   :  { %3737 = vmatpush1.bf16.msra.mxu1 %v5023_v13  ;;  %v5123_v13 = vld [vmem:[#allocation17 + $0xf8] ss:$28 sps:$4 sm:$0xff]  }
 0x56c   :  { %3738 = vmatprep.subr.bf16.mxu1 %v5031_v14  ;;  %v5126_v14 = vld [vmem:[#allocation17 + $0xbc] ss:$28 sps:$4 sm:$0xff]  }
 0x56f   :  { %3739 = vmatpush1.bf16.msra.mxu1 %v5029_v15  ;;  %v5127_v15 = vld [vmem:[#allocation17 + $0x280] ss:$28 sps:$4 sm:$0xff]  }
 0x570   :  { %3740 = vmatprep.subr.bf16.mxu1 %v5037_v16  ;;  %v5124_v16 = vld [vmem:[#allocation17 + $0xb8] ss:$28 sps:$4 sm:$0xff]  }
 0x573   :  { %3741 = vmatpush1.bf16.msra.mxu1 %v5035_v17  ;;  %v5128_v17 = vld [vmem:[#allocation17 + $0xc0] ss:$28 sps:$4 sm:$0xff]  }
 0x574   :  { %3742 = vmatprep.subr.bf16.mxu1 %v5043_v19  ;;  %v5131_v19 = vld [vmem:[#allocation17 + $0x84] ss:$28 sps:$4 sm:$0xff]  }
 0x577   :  { %3743 = vmatpush1.bf16.msra.mxu1 %v5041_v21  ;;  %v5132_v21 = vld [vmem:[#allocation17 + $0x248] ss:$28 sps:$4 sm:$0xff]  }
 0x578   :  { %3744 = vmatprep.subr.bf16.mxu1 %v5049_v22  ;;  %v5129_v22 = vld [vmem:[#allocation17 + $0x80] ss:$28 sps:$4 sm:$0xff]  }
 0x57b   :  { %3745 = vmatpush1.bf16.msra.mxu1 %v5047_v25  ;;  %v5133_v25 = vld [vmem:[#allocation17 + $0x88] ss:$28 sps:$4 sm:$0xff]  }
 0x57c   :  { %3746 = vmatprep.subr.bf16.mxu1 %v5055_v28  ;;  %v5136_v28 = vld [vmem:[#allocation17 + $0x4c] ss:$28 sps:$4 sm:$0xff]  }
 0x57f   :  { %3747 = vmatpush1.bf16.msra.mxu1 %v5053_v29  ;;  %v5137_v29 = vld [vmem:[#allocation17 + $0x210] ss:$28 sps:$4 sm:$0xff]  }
 0x580   :  { %3748 = vmatprep.subr.bf16.mxu1 %v5061_v30  ;;  %v5134_v30 = vld [vmem:[#allocation17 + $0x48] ss:$28 sps:$4 sm:$0xff]  }
 0x583   :  { %3749 = vmatpush2.bf16.msra.mxu1 %v5059_v31  ;;  %v5138_v31 = vld [vmem:[#allocation17 + $0x50] ss:$28 sps:$4 sm:$0xff]  }
 0x584   :  { %3750 = vmatprep.subr.bf16.mxu1 %v5067_v23  ;;  %v5141_v23 = vld [vmem:[#allocation17 + $0x14] ss:$28 sps:$4 sm:$0xff]  }
 0x587   :  { %3751 = vmatpush2.bf16.msra.mxu1 %v5065_v26  ;;  %v5142_v26 = vld [vmem:[#allocation17 + $0x1d8] ss:$28 sps:$4 sm:$0xff]  }
 0x588   :  { %3752 = vmatprep.subr.bf16.mxu1 %v5073_v32  ;;  %v5139_v32 = vld [vmem:[#allocation17 + $0x10] ss:$28 sps:$4 sm:$0xff]  }
 0x58b   :  { %3753 = vmatpush2.bf16.msra.mxu1 %v5071_v24  ;;  %v5143_v24 = vld [vmem:[#allocation17 + $0x18] ss:$28 sps:$4 sm:$0xff]  }
 0x58c   :  { %3754 = vmatprep.subr.bf16.mxu1 %v5079_v33  ;;  %v5146_v33 = vld [vmem:[#allocation17 + $0x35c] ss:$28 sps:$4 sm:$0xff]  }
 0x58f   :  { %3755 = vmatpush2.bf16.msra.mxu1 %v5077_v34  ;;  %v5144_v34 = vld [vmem:[#allocation17 + $0x358] ss:$28 sps:$4 sm:$0xff]  }
 0x590   :  { %3756 = vmatprep.subr.bf16.mxu1 %v5085_v27  ;;  %v5149_v27 = vld [vmem:[#allocation17 + $0x324] ss:$28 sps:$4 sm:$0xff]  }
 0x593   :  { %3757 = vmatpush2.bf16.msra.mxu1 %v5083_v35  ;;  %v5147_v35 = vld [vmem:[#allocation17 + $0x320] ss:$28 sps:$4 sm:$0xff]  }
 0x594   :  { %3758 = vmatprep.subr.bf16.mxu1 %v5091_v36  ;;  %v5152_v36 = vld [vmem:[#allocation17 + $0x2ec] ss:$28 sps:$4 sm:$0xff]  }
 0x597   :  { %3759 = vmatpush2.bf16.msra.mxu1 %v5089_v37  ;;  %v5150_v37 = vld [vmem:[#allocation17 + $0x2e8] ss:$28 sps:$4 sm:$0xff]  }
 0x598   :  { %3760 = vmatprep.subr.bf16.mxu1 %v5097_v52  ;;  %v5153_v52 = vld [vmem:[#allocation17 + $0x2b0] ss:$28 sps:$4 sm:$0xff]  }
 0x59b   :  { %3761 = vmatpush2.bf16.msra.mxu1 %v5095_v40  ;;  %v5156_v40 = vld [vmem:[#allocation17 + $0x278] ss:$28 sps:$4 sm:$0xff]  }
 0x59c   :  { %3762 = vmatprep.subr.bf16.mxu1 %v5103_v43  ;;  %v5159_v43 = vld [vmem:[#allocation17 + $0x240] ss:$28 sps:$4 sm:$0xff]  }
 0x59f   :  { %3763 = vmatpush2.bf16.msra.mxu1 %v5101_v45  ;;  %v5162_v45 = vld [vmem:[#allocation17 + $0x208] ss:$28 sps:$4 sm:$0xff]  }
 0x5a0   :  { %4435 = vmatprep.subr.bf16.mxu1 %v5107_v48  ;;  %v5165_v48 = vld [vmem:[#allocation17 + $0x1d0] ss:$28 sps:$4 sm:$0xff]  }
 0x622   :  { %v2939_v54 = vpop.f32.mrf.mxu1 }
 0x623   :  { %v2940_v55 = vadd.f32 %v2939_v54, %v2818_v51 }
 0x624   :  { %v2941_v56 = vpop.f32.mrf.mxu1 }
 0x625   :  { %v2942_v57 = vadd.f32 %v2941_v56, %v2822_v53  ;;  %v2946_v58 = vmax.f32 %v2940_v55, 0.0 }
 0x626   :  { %v2943_v59 = vpop.f32.mrf.mxu1 }
 0x627   :  { %v2947_v60 = vmax.f32 %v2942_v57, 0.0  ;;  %v5710_v18 = vpack.c.bf16 %v2946_v58, %v2946_v58 }
 0x628   :  { %v2944_v61 = vpop.f32.mrf.mxu1 }
 0x629   :  { %v2949_v62 = vpack.c.bf16 %v2947_v60, %v2947_v60 }
 0x62b   :  { %3723 = vmatprep.mubr.bf16.mxu0 %v2949_v62  ;;  %3764 = vmatprep.mubr.bf16.mxu1 %v2949_v62 }
 0x62c   :  { %3724 = vmatmul.mubr.bf16.vlgmr.msra.gmra.mxu0 %v5710_v18  ;;  %3765 = vmatmul.mubr.bf16.vlgmr.msra.gmra.mxu1 %v5710_v18 }
 0x62d   :  { %3774 = vmatpush1.bf16.msra.mxu0 %v5104_v63  ;;  %4436 = vmatpush3.bf16.msra.mxu1 %v5108_v0 }
 0x62e   :  { %3805 = vmatprep.mubr.bf16.mxu0 %v2949_v62  ;;  %3846 = vmatprep.mubr.bf16.mxu1 %v2949_v62 }
 0x62f   :  { %3775 = vmatprep.subr.bf16.mxu0 %v5111_v1  ;;  %4437 = vmatprep.subr.bf16.mxu1 %v5112_v49 }
 0x631   :  { %3776 = vmatpush1.bf16.msra.mxu0 %v5109_v2  ;;  %4438 = vmatpush3.bf16.msra.mxu1 %v5113_v3 }
 0x632   :  { %3777 = vmatprep.subr.bf16.mxu0 %v5116_v8  ;;  %4439 = vmatprep.subr.bf16.mxu1 %v5117_v5 }
 0x635   :  { %3778 = vmatpush1.bf16.msra.mxu0 %v5114_v7  ;;  %4440 = vmatpush3.bf16.msra.mxu1 %v5118_v10 }
 0x636   :  { %3779 = vmatprep.subr.bf16.mxu0 %v5121_v11  ;;  %4441 = vmatprep.subr.bf16.mxu1 %v5122_v39 }
 0x639   :  { %3780 = vmatpush1.bf16.msra.mxu0 %v5119_v12  ;;  %4442 = vmatpush3.bf16.msra.mxu1 %v5123_v13 }
 0x63a   :  { %3781 = vmatprep.subr.bf16.mxu0 %v5126_v14  ;;  %4443 = vmatprep.subr.bf16.mxu1 %v5127_v15 }
 0x63d   :  { %3782 = vmatpush1.bf16.msra.mxu0 %v5124_v16  ;;  %4444 = vmatpush3.bf16.msra.mxu1 %v5128_v17 }
 0x63e   :  { %3783 = vmatprep.subr.bf16.mxu0 %v5131_v19  ;;  %4445 = vmatprep.subr.bf16.mxu1 %v5132_v21 }
 0x641   :  { %3784 = vmatpush1.bf16.msra.mxu0 %v5129_v22  ;;  %4446 = vmatpush3.bf16.msra.mxu1 %v5133_v25 }
 0x642   :  { %3785 = vmatprep.subr.bf16.mxu0 %v5136_v28  ;;  %4447 = vmatprep.subr.bf16.mxu1 %v5137_v29 }
 0x645   :  { %3786 = vmatpush1.bf16.msra.mxu0 %v5134_v30  ;;  %4448 = vmatpush3.bf16.msra.mxu1 %v5138_v31 }
 0x646   :  { %3787 = vmatprep.subr.bf16.mxu0 %v5141_v23  ;;  %4449 = vmatprep.subr.bf16.mxu1 %v5142_v26 }
 0x649   :  { %3788 = vmatpush1.bf16.msra.mxu0 %v5139_v32  ;;  %4450 = vmatpush3.bf16.msra.mxu1 %v5143_v24 }
 0x64a   :  { %3789 = vmatprep.subr.bf16.mxu0 %v5146_v33 }
 0x64c   :  { %3847 = vmatmul.mubr.bf16.vlgmr.msra.gmra.mxu1 %v5710_v18 }
 0x64d   :  { %3790 = vmatpush2.bf16.msra.mxu0 %v5144_v34 }
 0x64e   :  { %3791 = vmatprep.subr.bf16.mxu0 %v5149_v27 }
 0x651   :  { %3792 = vmatpush2.bf16.msra.mxu0 %v5147_v35 }
 0x652   :  { %3793 = vmatprep.subr.bf16.mxu0 %v5152_v36 }
 0x655   :  { %3794 = vmatpush2.bf16.msra.mxu0 %v5150_v37 }
 0x656   :  { %3795 = vmatprep.subr.bf16.mxu0 %v5155_v4 }
 0x659   :  { %3796 = vmatpush2.bf16.msra.mxu0 %v5153_v52 }
 0x65a   :  { %3797 = vmatprep.subr.bf16.mxu0 %v5158_v9 }
 0x65d   :  { %3798 = vmatpush2.bf16.msra.mxu0 %v5156_v40 }
 0x65e   :  { %3799 = vmatprep.subr.bf16.mxu0 %v5161_v42 }
 0x661   :  { %3800 = vmatpush2.bf16.msra.mxu0 %v5159_v43 }
 0x662   :  { %3801 = vmatprep.subr.bf16.mxu0 %v5164_v44 }
 0x665   :  { %3802 = vmatpush2.bf16.msra.mxu0 %v5162_v45 }
 0x666   :  { %3803 = vmatprep.subr.bf16.mxu0 %v5167_v46 }
 0x669   :  { %3804 = vmatpush2.bf16.msra.mxu0 %v5165_v48 }
 0x66c   :  { %3806 = vmatmul.mubr.bf16.vlgmr.msra.gmra.mxu0 %v5710_v18 }
 0x66d   :  { %5409 = shalt.err (!%p5406_p12)
}
 0x66e   :  { %3922 = dma.vmem_to_hbm [thread:$0]  %s3920_s26, 128, %s5751_s17, [#allocation21]   ;;  %v3078_v50 = vld [vmem:[%s5749_s15] sm:$0xff]  ;;  %v3106_v12 = vsub.s32 6, %v5651_v47  ;;  %v3098_v26 = vsub.s32 4, %v5651_v47  ;;  %v3102_v32 = vsub.s32 5, %v5651_v47 }
 0x66f   :  { %v3083_v51 = vrot.slane %v3078_v50, %v5654_v20  ;;  %v3091_v53 = vrot.slane %v3078_v50, %v438_v38  ;;  %v3087_v54 = vrot.slane %v3078_v50, %v5660_v6  ;;  %v3095_v55 = vrot.slane %v3078_v50, %v442_v41  ;;  %s5476_s15 = smov [#allocation19]  }
 0x670   :  { %v3107_v14 = vrot.slane %v3078_v50, %v3106_v12  ;;  %v3099_v24 = vrot.slane %v3078_v50, %v3098_v26  ;;  %v3103_v33 = vrot.slane %v3078_v50, %v3102_v32  ;;  %s3909_s17 = sshll.u32 %s5476_s15, 4  ;;  %s3910_s17 = int_to_ptr.vmem [resolvable:$true] %s3909_s17 }
 0x671   :  { %s5418_s25 = scalar_lea.vmem %s3910_s17, 896  ;;  %p5423_p0 = scmp.lt.s32.totalorder %s3910_s17, %s3910_s17 }
 0x672   :  { %p5419_p13 = scmp.ne.s32.totalorder %s3910_s17, %s5418_s25  ;;  %p5424_p1 = scmp.lt.s32.totalorder %s5418_s25, %s5418_s25 }
 0x674   :  { %p5425_p2 = por %p5424_p1, %p5423_p0 }
 0x676   :  { %p5426_p3 = pnand %p5425_p2, %p5419_p13 }
 0x6ec   :  { %v3725_v56 = vpop.f32.mrf.mxu0  ;;  %v3766_v57 = vpop.f32.mrf.mxu1 }
 0x6ed   :  { %v3726_v58 = vadd.f32 %v3725_v56, %v3083_v51  ;;  %v3767_v59 = vadd.f32 %v3766_v57, %v3091_v53 }
 0x6ee   :  { %v3727_v60 = vpop.f32.mrf.mxu0  ;;  %v3768_v61 = vpop.f32.mrf.mxu1 }
 0x6ef   :  { %v4388_v62 = vmul.f32 -1.442695, %v3726_v58  ;;  %v4390_v63 = vmul.f32 -1.442695, %v3767_v59  ;;  %v3728_v0 = vadd.f32 %v3727_v60, %v3087_v54  ;;  %v3769_v18 = vadd.f32 %v3768_v61, %v3095_v55 }
 0x6f0   :  { %v3729_v1 = vpop.f32.mrf.mxu0  ;;  %v3770_v20 = vpop.f32.mrf.mxu1 }
 0x6f1   :  { %5170 = vpow2.f32 %v4388_v62  ;;  %v4389_v49 = vmul.f32 -1.442695, %v3728_v0  ;;  %v4391_v38 = vmul.f32 -1.442695, %v3769_v18 }
 0x6f2   :  { %5172 = vpow2.f32 %v4390_v63  ;;  %v3730_v6 = vpop.f32.mrf.mxu0  ;;  %v3771_v2 = vpop.f32.mrf.mxu1 }
 0x6f3   :  { %5174 = vpow2.f32 %v4389_v49 }
 0x6f4   :  { %5176 = vpow2.f32 %v4391_v38 }
 0x6fe   :  { %v5171_v41 = vpop.eup %5170 }
 0x6ff   :  { %v5173_v3 = vpop.eup %5172  ;;  %v3875_v8 = vadd.f32 1.0, %v5171_v41 }
 0x700   :  { %v5175_v5 = vpop.eup %5174  ;;  %v3877_v7 = vadd.f32 1.0, %v5173_v3 }
 0x701   :  { %v5177_v10 = vpop.eup %5176  ;;  %5178 = vrcp.f32 %v3875_v8  ;;  %v3876_v11 = vadd.f32 1.0, %v5175_v5 }
 0x702   :  { %5180 = vrcp.f32 %v3877_v7  ;;  %v3878_v39 = vadd.f32 1.0, %v5177_v10 }
 0x703   :  { %5182 = vrcp.f32 %v3876_v11 }
 0x704   :  { %5184 = vrcp.f32 %v3878_v39 }
 0x70c   :  { %v4451_v13 = vpop.f32.mrf.mxu1 }
 0x70e   :  { %v5179_v15 = vpop.eup %5178  ;;  %v4452_v16 = vpop.f32.mrf.mxu1 }
 0x70f   :  { %v5181_v17 = vpop.eup %5180  ;;  %3896 = vst [vmem:[#allocation19] sm:$0xff] %v5179_v15  ;;  %v4453_v19 = vadd.f32 %v4452_v16, %v4451_v13 }
 0x710   :  { %v5183_v21 = vpop.eup %5182  ;;  %3898 = vst [vmem:[#allocation19 + $0x10] sm:$0xff] %v5181_v17  ;;  %v4454_v22 = vpop.f32.mrf.mxu1 }
 0x711   :  { %v5185_v25 = vpop.eup %5184  ;;  %3897 = vst [vmem:[#allocation19 + $0x8] sm:$0xff] %v5183_v21  ;;  %v3849_v28 = vadd.f32 %v4453_v19, %v3107_v14 }
 0x712   :  { %3899 = vst [vmem:[#allocation19 + $0x18] sm:$0xff] %v5185_v25  ;;  %v4455_v29 = vpop.f32.mrf.mxu1 }
 0x713   :  { %v4394_v30 = vmul.f32 -1.442695, %v3849_v28 }
 0x715   :  { %5186 = vpow2.f32 %v4394_v30 }
 0x722   :  { %v5187_v31 = vpop.eup %5186 }
 0x723   :  { %v3881_v23 = vadd.f32 1.0, %v5187_v31 }
 0x725   :  { %5188 = vrcp.f32 %v3881_v23 }
 0x72c   :  { %v3807_v34 = vpop.f32.mrf.mxu0 }
 0x72d   :  { %v3808_v27 = vadd.f32 %v3807_v34, %v3099_v24 }
 0x72e   :  { %v3809_v35 = vpop.f32.mrf.mxu0 }
 0x72f   :  { %v4392_v36 = vmul.f32 -1.442695, %v3808_v27  ;;  %v3810_v37 = vadd.f32 %v3809_v35, %v3103_v33 }
 0x730   :  { %v3811_v4 = vpop.f32.mrf.mxu0 }
 0x731   :  { %5190 = vpow2.f32 %v4392_v36  ;;  %v4393_v52 = vmul.f32 -1.442695, %v3810_v37 }
 0x732   :  { %v5189_v9 = vpop.eup %5188  ;;  %v3812_v40 = vpop.f32.mrf.mxu0 }
 0x733   :  { %3902 = vst [vmem:[#allocation19 + $0x30] sm:$0xff] %v5189_v9  ;;  %5192 = vpow2.f32 %v4393_v52 }
 0x73e   :  { %v5191_v42 = vpop.eup %5190 }
 0x73f   :  { %v3879_v43 = vadd.f32 1.0, %v5191_v42 }
 0x740   :  { %v5193_v44 = vpop.eup %5192 }
 0x741   :  { %5194 = vrcp.f32 %v3879_v43  ;;  %v3880_v45 = vadd.f32 1.0, %v5193_v44 }
 0x743   :  { %5196 = vrcp.f32 %v3880_v45 }
 0x74e   :  { %v5195_v47 = vpop.eup %5194 }
 0x74f   :  { %3900 = vst [vmem:[#allocation19 + $0x20] sm:$0xff] %v5195_v47 }
 0x750   :  { %v5197_v46 = vpop.eup %5196 }
 0x751   :  { %3901 = vst [vmem:[#allocation19 + $0x28] sm:$0xff] %v5197_v46 }
 0x752   :  { %5429 = shalt.err (!%p5426_p3)
}
 0x753   :  { %3912 = dma.vmem_to_hbm [thread:$0]  %s3910_s17, 896, %s5750_s16, [#allocation4]  }
 0x754   :  { %5450 = dma.done.wait [#allocation4], 896  }
 0x755   :  { %5451 = vsyncadd [#allocation4], 4294966400 }
 0x756   :  { %5452 = dma.done.wait [#allocation21], 128  }
 0x757   :  { %5453 = vsyncadd [#allocation21], 4294967168 }
 0x758   :  { %3929 = vsyncpa [#allocation3], 1 }
 0x759   :  { %3930 = vsyncpa [#allocation6], 1 }
 0x75a   :  { %3931 = vsyncpa [#allocation9], 1 }
 0x75b   :  { %3932 = vsyncpa [#allocation12], 1 }
 0x75c   :  { %3933 = vsyncpa [#allocation15], 1 }
 0x75d   :  { %3934 = vsyncpa [#allocation18], 1 }
 0x75e   :  { %3935 = vsyncpa [#allocation4], 1 }
 0x75f   :  { %3936 = vsyncpa [#allocation21], 1 }

</bundles_post_ra>
